<compile_context>
chip_gen: v6e
topology: v6e:2x2x1
jax: 0.10.0
libtpu: 0.0.40
codegen_flags: <defaults>
</compile_context>

<pallas_src>
import math
from functools import partial

import jax
import jax.numpy as jnp
from jax.experimental import pallas as pl
from jax.experimental.pallas import tpu as pltpu

NEG_SLOPE = 0.2

# conv1 tap order of the K-folded operand / weight (K index = tap-major,
# channel-minor).  This is exactly the order in which the 5 contiguous slices
# of the space-to-depth packed input are concatenated inside the kernel.
_TAP_ORDER = ((0, 0), (0, 1), (1, 0), (1, 1), (0, 2), (1, 2), (2, 0), (2, 1), (2, 2))


def _round_up(v, m):
    return (v + m - 1) // m * m


# ---------------------------------------------------------------------------
# Trace-time hardware queries / planning (plain Python, outside jit)
# ---------------------------------------------------------------------------
_VMEM_CAP = None


def _vmem_capacity_bytes():
    global _VMEM_CAP
    if _VMEM_CAP is None:
        try:
            _VMEM_CAP = int(pltpu.get_tpu_info().vmem_capacity_bytes)
        except Exception:
            _VMEM_CAP = 64 * 1024 * 1024        # conservative (v7x per-TC)
    return _VMEM_CAP


_ROLL_MODE = None


def _roll_mode():
    """Probe pltpu.roll's rotation direction once with a tiny kernel.

    Returns "roll_fwd" if roll(x, s)[i] == x[i - s] (jnp.roll convention),
    "roll_rev" if roll(x, s)[i] == x[i + s], or "concat" if roll is not
    usable on this build (the kernel then falls back to concat-based shifts).
    """
    global _ROLL_MODE
    if _ROLL_MODE is not None:
        return _ROLL_MODE
    try:
        def probe(o_ref):
            x = jax.lax.broadcasted_iota(jnp.int32, (2, 8, 128), 1)
            o_ref[...] = pltpu.roll(x, 1, 1)

        out = pl.pallas_call(
            probe, out_shape=jax.ShapeDtypeStruct((2, 8, 128), jnp.int32))()
        v = int(out[0, 1, 0])
        if v == 0:
            _ROLL_MODE = "roll_fwd"
        elif v == 2:
            _ROLL_MODE = "roll_rev"
        else:
            _ROLL_MODE = "concat"
    except Exception:
        _ROLL_MODE = "concat"
    return _ROLL_MODE


def _plan(N, Ho, Wo, Cin, Cp):
    """Pick the per-step batch block (nb) and a right-sized vmem limit."""
    CP = _round_up(Cp, 128)
    r8 = lambda v: _round_up(v, 8)
    r128 = lambda v: _round_up(v, 128)
    # Padded per-image VMEM footprints (f32, conservative).
    in_img = (Ho + 1) * r8(Wo + 1) * r128(4 * Cin) * 4
    scr_img = (Ho + 2) * r8(Wo) * CP * 4
    out_img = Ho * r8(Wo) * CP * 4
    live_img = Ho * Wo * (r128(9 * Cin) + 4 * CP) * 4     # A1 + A2 + accumulators
    per_img = 2 * in_img + scr_img + 2 * out_img + live_img
    w_bytes = 2 * 4 * (r8(9 * Cin) + 3 * r8(3 * CP) + r8(Cin) + 3 * 8) * CP

    cap = _vmem_capacity_bytes()
    budget = int(cap * 0.6)
    nb = 1
    for cand in range(1, N + 1):
        if N % cand:
            continue
        if cand * Ho * Wo > 4096:      # keep matmul M / vreg pressure bounded
            break
        if w_bytes + cand * per_img <= budget:
            nb = cand
    need = w_bytes + nb * per_img
    vmem_limit = int(min(max(need + (8 << 20), 32 << 20), int(cap * 0.9)))
    return nb, vmem_limit


# ---------------------------------------------------------------------------
# Fused Pallas kernel (nb batch elements per grid step)
# ---------------------------------------------------------------------------
def _fused_kernel(x4_ref, w1_ref, w2_ref, wp_ref, b1_ref, b2_ref, bp_ref,
                  o_ref, y1_ref, *, skip: bool, shift_mode: str):
    # x4_ref : (NB, Ho+1, Wo+1, 4*Cin)  space-to-depth packed, zero-padded input
    #          (channel layout: [ee, eo, oe, oo] x Cin phases of padded x)
    # w1_ref : (9*Cin, CP)   K-folded conv1 weights (tap order = _TAP_ORDER)
    # w2_ref : (3, 3*CP, CP) per-ki K-folded conv2 weights (kj-major K)
    # wp_ref : (Cin, CP)     1x1 skip projection
    # b*_ref : (1, CP) f32
    # o_ref  : (NB, Ho, Wo, CP) f32  lane-dense output
    # y1_ref : (NB, Ho+2, Wo, CP) f32 scratch (conv1 output + 1-row zero halo)
    NB, _, _, C4 = x4_ref.shape
    Cin = C4 // 4
    _, Ho, Wo, CP = o_ref.shape
    M = NB * Ho * Wo
    cdt = w1_ref.dtype                      # MXU operand dtype (f32 or bf16)

    def lrelu(v):
        return jnp.where(v > 0, v, NEG_SLOPE * v)

    # ---- conv1 (3x3 / stride 2): ONE K-folded matmul, K = 9*Cin -------------
    x4 = x4_ref[...]
    a1 = jnp.concatenate(
        [x4[:, 0:Ho, 0:Wo, :],                          # taps (0,0)(0,1)(1,0)(1,1)
         x4[:, 0:Ho, 1:Wo + 1, 0:Cin],                  # tap (0,2)  (phase ee)
         x4[:, 0:Ho, 1:Wo + 1, 2 * Cin:3 * Cin],        # tap (1,2)  (phase oe)
         x4[:, 1:Ho + 1, 0:Wo, 0:2 * Cin],              # taps (2,0)(2,1) (ee,eo)
         x4[:, 1:Ho + 1, 1:Wo + 1, 0:Cin]],             # tap (2,2)  (ee)
        axis=-1).reshape(M, 9 * Cin)
    acc1 = jnp.dot(a1.astype(cdt), w1_ref[...],
                   preferred_element_type=jnp.float32)
    y1 = lrelu(acc1 + b1_ref[...])                      # (M, CP) f32

    # ---- stage conv1 output in VMEM: row halo only, aligned slab stores -----
    # The 2 halo rows are re-zeroed every step (cheap: 2/(Ho+2) of the scratch)
    # instead of once at program_id==0, so the kernel stays correct when the
    # "parallel" grid axis is sharded across TensorCores.
    zrow = jnp.zeros((NB, 1, Wo, CP), y1_ref.dtype)
    y1_ref[:, 0:1, :, :] = zrow
    y1_ref[:, Ho + 1:Ho + 2, :, :] = zrow
    y1_ref[:, 1:Ho + 1, :, :] = y1.reshape(NB, Ho, Wo, CP)

    # ---- conv2 (3x3 / stride 1): 3 K-folded matmuls, K = 3*CP ---------------
    if shift_mode != "concat":
        wi = jax.lax.broadcasted_iota(jnp.int32, (NB * Ho, Wo, CP), 1)
        first_col = wi == 0
        last_col = wi == Wo - 1

    def shift_w(r3, dc):
        # out[:, c, :] = r3[:, c + dc, :], zero where c + dc is out of range.
        if shift_mode == "concat":
            z = jnp.zeros((r3.shape[0], 1, CP), r3.dtype)
            if dc == -1:
                return jnp.concatenate([z, r3[:, :Wo - 1, :]], axis=1)
            return jnp.concatenate([r3[:, 1:, :], z], axis=1)
        shift = (-dc) % Wo if shift_mode == "roll_fwd" else dc % Wo
        rolled = pltpu.roll(r3, shift, 1)                   # XLU sublane rotate
        return jnp.where(first_col if dc == -1 else last_col, 0.0, rolled)

    acc2 = None
    for ki in range(3):                                     # static unroll (3)
        r3 = y1_ref[:, ki:ki + Ho, :, :].reshape(NB * Ho, Wo, CP)
        a2 = jnp.concatenate([shift_w(r3, -1), r3, shift_w(r3, +1)],
                             axis=-1).reshape(M, 3 * CP)
        d = jnp.dot(a2.astype(cdt), w2_ref[ki],
                    preferred_element_type=jnp.float32)
        acc2 = d if acc2 is None else acc2 + d
    y2 = lrelu(acc2 + b2_ref[...])                          # (M, CP) f32

    # ---- 1x1 / stride-2 skip: reuses the already-resident odd/odd phase -----
    if skip:
        xs = x4[:, 0:Ho, 0:Wo, 3 * Cin:4 * Cin].reshape(M, Cin)   # x[2r, 2c]
        y2 = y2 + jnp.dot(xs.astype(cdt), wp_ref[...],
                          preferred_element_type=jnp.float32) + bp_ref[...]

    o_ref[...] = y2.reshape(NB, Ho, Wo, CP).astype(o_ref.dtype)


# ---------------------------------------------------------------------------
# Wrapper: NCHW in/out, EqualLR scaling, packing, channel padding
# ---------------------------------------------------------------------------
@partial(jax.jit,
         static_argnames=("nb", "skip", "use_bf16", "vmem_limit", "shift_mode"))
def _forward(x_nchw, w1, b1, w2, b2, wp, bp, *,
             nb, skip, use_bf16, vmem_limit, shift_mode):
    N, Cin, H, W = x_nchw.shape
    Cp = w1.shape[0]
    Ho, Wo = H // 2, W // 2
    CP = _round_up(Cp, 128)                 # lane-dense output channels
    wdt = jnp.bfloat16 if use_bf16 else jnp.float32

    # EqualLR: weight * 1/sqrt(fan_in) applied at forward time.
    s1 = 1.0 / math.sqrt(Cin * 9)
    s2 = 1.0 / math.sqrt(Cp * 9)
    sp = 1.0 / math.sqrt(Cin)

    # conv1: torch (Co,Ci,3,3) -> K-folded (9*Cin, CP) in _TAP_ORDER.
    w1t = jnp.transpose(w1 * s1, (2, 3, 1, 0))             # (ki, kj, ci, co)
    w1m = jnp.concatenate([w1t[ki, kj] for ki, kj in _TAP_ORDER], axis=0)
    w1m = jnp.pad(w1m, ((0, 0), (0, CP - Cp))).astype(wdt)

    # conv2: per-ki K-folded (3, 3*CP, CP) with kj-major K ordering.
    w2t = jnp.transpose(w2 * s2, (2, 3, 1, 0))             # (ki, kj, ci, co)
    w2k = jnp.pad(w2t, ((0, 0), (0, 0), (0, CP - Cp), (0, CP - Cp)))
    w2k = w2k.reshape(3, 3 * CP, CP).astype(wdt)

    # 1x1 skip projection.
    wpm = jnp.pad(jnp.transpose(wp[:, :, 0, 0] * sp, (1, 0)),
                  ((0, 0), (0, CP - Cp))).astype(wdt)

    b1p = jnp.pad(b1, (0, CP - Cp)).reshape(1, CP).astype(jnp.float32)
    b2p = jnp.pad(b2, (0, CP - Cp)).reshape(1, CP).astype(jnp.float32)
    bpp = jnp.pad(bp, (0, CP - Cp)).reshape(1, CP).astype(jnp.float32)

    # NHWC, zero-pad by 1, space-to-depth(2): a single packed input stream
    # whose last dim is the 4 stride-2 phases [ee, eo, oe, oo] x Cin.
    x = jnp.transpose(x_nchw, (0, 2, 3, 1))
    xp = jnp.pad(x, ((0, 0), (1, 1), (1, 1), (0, 0)))
    x4 = xp.reshape(N, Ho + 1, 2, Wo + 1, 2, Cin)
    x4 = x4.transpose(0, 1, 3, 2, 4, 5).reshape(N, Ho + 1, Wo + 1, 4 * Cin)

    const2 = lambda n: (0, 0)
    const3 = lambda n: (0, 0, 0)

    out = pl.pallas_call(
        partial(_fused_kernel, skip=skip, shift_mode=shift_mode),
        out_shape=jax.ShapeDtypeStruct((N, Ho, Wo, CP), jnp.float32),
        grid=(N // nb,),
        in_specs=[
            pl.BlockSpec((nb, Ho + 1, Wo + 1, 4 * Cin), lambda n: (n, 0, 0, 0)),
            # grid-invariant weight/bias operands (index maps never change)
            pl.BlockSpec((9 * Cin, CP), const2),
            pl.BlockSpec((3, 3 * CP, CP), const3),
            pl.BlockSpec((Cin, CP), const2),
            pl.BlockSpec((1, CP), const2),
            pl.BlockSpec((1, CP), const2),
            pl.BlockSpec((1, CP), const2),
        ],
        out_specs=pl.BlockSpec((nb, Ho, Wo, CP), lambda n: (n, 0, 0, 0)),
        scratch_shapes=[pltpu.VMEM((nb, Ho + 2, Wo, CP), jnp.float32)],
        compiler_params=pltpu.CompilerParams(
            dimension_semantics=("parallel",),
            vmem_limit_bytes=vmem_limit),
    )(x4, w1m, w2k, wpm, b1p, b2p, bpp)

    y = out[:, :, :, :Cp]                     # drop padded output lanes
    return jnp.transpose(y, (0, 3, 1, 2))     # back to NCHW


def residual_cc_block_first_down(x_nchw, params, stride=2, kernel_size=3,
                                 skip=True, use_bf16=False):
    assert stride == 2 and kernel_size == 3, "kernel specialized for 3x3 / stride 2"
    w1, b1, w2, b2, wp, bp = params
    N, Cin, H, W = x_nchw.shape
    assert H % 2 == 0 and W % 2 == 0
    Cp = w1.shape[0]
    nb, vmem_limit = _plan(N, H // 2, W // 2, Cin, Cp)
    return _forward(x_nchw, w1, b1, w2, b2, wp, bp,
                    nb=nb, skip=skip, use_bf16=use_bf16,
                    vmem_limit=vmem_limit, shift_mode=_roll_mode())


# ---------------------------------------------------------------------------
# Pure-JAX reference (lax.conv) for correctness check
# ---------------------------------------------------------------------------
def _reference_forward(x_nchw, params, stride=2, kernel_size=3, skip=True):
    w1, b1, w2, b2, wp, bp = params
    k = kernel_size
    p = k // 2
    x = jnp.transpose(x_nchw, (0, 2, 3, 1))
    Cin = x.shape[-1]
    Cp = w1.shape[0]

    def conv(inp, w_oihw, bias, scale, st, pad):
        w_hwio = jnp.transpose(w_oihw * scale, (2, 3, 1, 0))
        y = jax.lax.conv_general_dilated(
            inp, w_hwio, (st, st), [(pad, pad), (pad, pad)],
            dimension_numbers=("NHWC", "HWIO", "NHWC"))
        return y + bias.reshape(1, 1, 1, -1)

    def lrelu(v):
        return jnp.where(v > 0, v, NEG_SLOPE * v)

    s1 = 1.0 / math.sqrt(Cin * k * k)
    s2 = 1.0 / math.sqrt(Cp * k * k)
    sp = 1.0 / math.sqrt(Cin)
    y = lrelu(conv(x, w1, b1, s1, stride, p))
    y = lrelu(conv(y, w2, b2, s2, 1, p))
    if skip:
        y = y + conv(x, wp, bp, sp, stride, 0)
    return jnp.transpose(y, (0, 3, 1, 2))


if __name__ == "__main__":
    inplanes, planes = 4, 8
    N, H, W = 2, 16, 16

    key = jax.random.PRNGKey(0)
    k1, k2, k3, kb1, kb2, kb3, kx = jax.random.split(key, 7)
    # EqualLR convention: weight ~ N(0,1); scale applied at forward time.
    w1 = jax.random.normal(k1, (planes, inplanes, 3, 3), jnp.float32)
    b1 = 0.1 * jax.random.normal(kb1, (planes,), jnp.float32)
    w2 = jax.random.normal(k2, (planes, planes, 3, 3), jnp.float32)
    b2 = 0.1 * jax.random.normal(kb2, (planes,), jnp.float32)
    wp = jax.random.normal(k3, (planes, inplanes, 1, 1), jnp.float32)
    bp = 0.1 * jax.random.normal(kb3, (planes,), jnp.float32)
    params = (w1, b1, w2, b2, wp, bp)

    x = jax.random.normal(kx, (N, inplanes, H, W), jnp.float32)

    ref = _reference_forward(x, params)

    # f32 path: must match the f32 reference tightly.
    out = jax.block_until_ready(residual_cc_block_first_down(x, params))
    assert out.shape == (N, planes, H // 2, W // 2), out.shape
    max_err = float(jnp.max(jnp.abs(out - ref)))
    assert jnp.allclose(out, ref, atol=1e-4, rtol=1e-4), max_err

    # bf16-MXU-operand path (v6e/v7x oriented): f32 accumulation, looser check.
    out_bf = jax.block_until_ready(
        residual_cc_block_first_down(x, params, use_bf16=True))
    max_err_bf = float(jnp.max(jnp.abs(out_bf - ref)))
    assert jnp.allclose(out_bf, ref, atol=0.15, rtol=0.1), max_err_bf

    print("KERNEL_OK")
</pallas_src>

<mosaic_0001>
module attributes {stable_mosaic.version = 11 : i64} {
  func.func @_fused_kernel(%arg0: i32, %arg1: memref<2x9x9x16xf32, #tpu.memory_space<vmem>>, %arg2: memref<36x128xf32, #tpu.memory_space<vmem>>, %arg3: memref<3x384x128xf32, #tpu.memory_space<vmem>>, %arg4: memref<4x128xf32, #tpu.memory_space<vmem>>, %arg5: memref<1x128xf32, #tpu.memory_space<vmem>>, %arg6: memref<1x128xf32, #tpu.memory_space<vmem>>, %arg7: memref<1x128xf32, #tpu.memory_space<vmem>>, %arg8: memref<2x8x8x128xf32, #tpu.memory_space<vmem>>, %arg9: memref<2x10x8x128xf32, #tpu.memory_space<vmem>>) attributes {dimension_semantics = [#tpu.dimension_semantics<parallel>], iteration_bounds = array<i64: 1>, scalar_prefetch = 0 : i64, scratch_operands = 1 : i64, tpu.core_type = #tpu.core_type<tc>, window_params = [{transform_indices = @transform_0, window_bounds = array<i64: 2, 9, 9, 16>}, {pipeline_mode = #tpu.pipeline_mode<synchronous>, transform_indices = @transform_1, window_bounds = array<i64: 36, 128>}, {pipeline_mode = #tpu.pipeline_mode<synchronous>, transform_indices = @transform_2, window_bounds = array<i64: 3, 384, 128>}, {pipeline_mode = #tpu.pipeline_mode<synchronous>, transform_indices = @transform_3, window_bounds = array<i64: 4, 128>}, {pipeline_mode = #tpu.pipeline_mode<synchronous>, transform_indices = @transform_4, window_bounds = array<i64: 1, 128>}, {pipeline_mode = #tpu.pipeline_mode<synchronous>, transform_indices = @transform_5, window_bounds = array<i64: 1, 128>}, {pipeline_mode = #tpu.pipeline_mode<synchronous>, transform_indices = @transform_6, window_bounds = array<i64: 1, 128>}, {transform_indices = @transform_7, window_bounds = array<i64: 2, 8, 8, 128>}]} {
    %c0 = arith.constant 0 : index
    %c0_0 = arith.constant 0 : index
    %c0_1 = arith.constant 0 : index
    %c0_2 = arith.constant 0 : index
    %0 = vector.load %arg1[%c0, %c0_0, %c0_1, %c0_2] : memref<2x9x9x16xf32, #tpu.memory_space<vmem>>, vector<2x9x9x16xf32>
    %1 = vector.extract_strided_slice %0 {offsets = [0, 0, 0, 0], sizes = [2, 8, 8, 16], strides = [1, 1, 1, 1]} : vector<2x9x9x16xf32> to vector<2x8x8x16xf32>
    %2 = vector.extract_strided_slice %0 {offsets = [0, 0, 1, 0], sizes = [2, 8, 8, 4], strides = [1, 1, 1, 1]} : vector<2x9x9x16xf32> to vector<2x8x8x4xf32>
    %3 = vector.extract_strided_slice %0 {offsets = [0, 0, 1, 8], sizes = [2, 8, 8, 4], strides = [1, 1, 1, 1]} : vector<2x9x9x16xf32> to vector<2x8x8x4xf32>
    %4 = vector.extract_strided_slice %0 {offsets = [0, 1, 0, 0], sizes = [2, 8, 8, 8], strides = [1, 1, 1, 1]} : vector<2x9x9x16xf32> to vector<2x8x8x8xf32>
    %5 = vector.extract_strided_slice %0 {offsets = [0, 1, 1, 0], sizes = [2, 8, 8, 4], strides = [1, 1, 1, 1]} : vector<2x9x9x16xf32> to vector<2x8x8x4xf32>
    %6 = tpu.concatenate %1, %2, %3, %4, %5 in 3 : vector<2x8x8x16xf32>, vector<2x8x8x4xf32>, vector<2x8x8x4xf32>, vector<2x8x8x8xf32>, vector<2x8x8x4xf32> -> vector<2x8x8x36xf32>
    %7 = vector.shape_cast %6 : vector<2x8x8x36xf32> to vector<128x36xf32>
    %c0_3 = arith.constant 0 : index
    %c0_4 = arith.constant 0 : index
    %8 = vector.load %arg2[%c0_3, %c0_4] : memref<36x128xf32, #tpu.memory_space<vmem>>, vector<36x128xf32>
    %cst = arith.constant dense<0.000000e+00> : vector<128x128xf32>
    %9 = tpu.matmul %7, %8, %cst {dimension_numbers = #tpu.dot_dimension_numbers<[1], [0], [0], [1], [0, 0, 1, 1], [], []>} : vector<128x36xf32>, vector<36x128xf32>, vector<128x128xf32> -> vector<128x128xf32>
    %c0_5 = arith.constant 0 : index
    %c0_6 = arith.constant 0 : index
    %10 = vector.load %arg5[%c0_5, %c0_6] : memref<1x128xf32, #tpu.memory_space<vmem>>, vector<1x128xf32>
    %11 = vector.broadcast %10 : vector<1x128xf32> to vector<128x128xf32>
    %12 = arith.addf %9, %11 : vector<128x128xf32>
    %cst_7 = arith.constant 0.000000e+00 : f32
    %13 = vector.broadcast %cst_7 : f32 to vector<128x128xf32>
    %14 = arith.cmpf ogt, %12, %13 : vector<128x128xf32>
    %cst_8 = arith.constant 2.000000e-01 : f32
    %15 = vector.broadcast %cst_8 : f32 to vector<128x128xf32>
    %16 = arith.mulf %15, %12 : vector<128x128xf32>
    %17 = arith.select %14, %12, %16 : vector<128x128xi1>, vector<128x128xf32>
    %cst_9 = arith.constant 0.000000e+00 : f32
    %18 = vector.broadcast %cst_9 : f32 to vector<2x1x8x128xf32>
    %c0_10 = arith.constant 0 : index
    %c0_11 = arith.constant 0 : index
    %c0_12 = arith.constant 0 : index
    %c0_13 = arith.constant 0 : index
    %19 = vector.load %arg9[%c0_10, %c0_11, %c0_12, %c0_13] : memref<2x10x8x128xf32, #tpu.memory_space<vmem>>, vector<2x1x8x128xf32>
    tpu.vector_store %arg9[%c0_10, %c0_11, %c0_12, %c0_13], %18 {strides = array<i32>} : memref<2x10x8x128xf32, #tpu.memory_space<vmem>>, vector<2x1x8x128xf32>,
    %c0_14 = arith.constant 0 : index
    %c9 = arith.constant 9 : index
    %c0_15 = arith.constant 0 : index
    %c0_16 = arith.constant 0 : index
    %20 = vector.load %arg9[%c0_14, %c9, %c0_15, %c0_16] : memref<2x10x8x128xf32, #tpu.memory_space<vmem>>, vector<2x1x8x128xf32>
    tpu.vector_store %arg9[%c0_14, %c9, %c0_15, %c0_16], %18 {strides = array<i32>} : memref<2x10x8x128xf32, #tpu.memory_space<vmem>>, vector<2x1x8x128xf32>,
    %21 = vector.shape_cast %17 : vector<128x128xf32> to vector<2x8x8x128xf32>
    %c0_17 = arith.constant 0 : index
    %c1 = arith.constant 1 : index
    %c0_18 = arith.constant 0 : index
    %c0_19 = arith.constant 0 : index
    %22 = vector.load %arg9[%c0_17, %c1, %c0_18, %c0_19] : memref<2x10x8x128xf32, #tpu.memory_space<vmem>>, vector<2x8x8x128xf32>
    tpu.vector_store %arg9[%c0_17, %c1, %c0_18, %c0_19], %21 {strides = array<i32>} : memref<2x10x8x128xf32, #tpu.memory_space<vmem>>, vector<2x8x8x128xf32>,
    %c0_20 = arith.constant 0 : index
    %c0_21 = arith.constant 0 : index
    %c0_22 = arith.constant 0 : index
    %c0_23 = arith.constant 0 : index
    %23 = vector.load %arg9[%c0_20, %c0_21, %c0_22, %c0_23] : memref<2x10x8x128xf32, #tpu.memory_space<vmem>>, vector<2x8x8x128xf32>
    %24 = vector.shape_cast %23 : vector<2x8x8x128xf32> to vector<16x8x128xf32>
    %cst_24 = arith.constant 0.000000e+00 : f32
    %25 = vector.broadcast %cst_24 : f32 to vector<16x1x128xf32>
    %26 = vector.extract_strided_slice %24 {offsets = [0, 0, 0], sizes = [16, 7, 128], strides = [1, 1, 1]} : vector<16x8x128xf32> to vector<16x7x128xf32>
    %27 = tpu.concatenate %25, %26 in 1 : vector<16x1x128xf32>, vector<16x7x128xf32> -> vector<16x8x128xf32>
    %cst_25 = arith.constant 0.000000e+00 : f32
    %28 = vector.broadcast %cst_25 : f32 to vector<16x1x128xf32>
    %29 = vector.extract_strided_slice %24 {offsets = [0, 1, 0], sizes = [16, 7, 128], strides = [1, 1, 1]} : vector<16x8x128xf32> to vector<16x7x128xf32>
    %30 = tpu.concatenate %29, %28 in 1 : vector<16x7x128xf32>, vector<16x1x128xf32> -> vector<16x8x128xf32>
    %31 = tpu.concatenate %27, %24, %30 in 2 : vector<16x8x128xf32>, vector<16x8x128xf32>, vector<16x8x128xf32> -> vector<16x8x384xf32>
    %32 = vector.shape_cast %31 : vector<16x8x384xf32> to vector<128x384xf32>
    %c0_26 = arith.constant 0 : index
    %c0_27 = arith.constant 0 : index
    %c0_28 = arith.constant 0 : index
    %33 = vector.load %arg3[%c0_26, %c0_27, %c0_28] : memref<3x384x128xf32, #tpu.memory_space<vmem>>, vector<1x384x128xf32>
    %34 = vector.shape_cast %33 : vector<1x384x128xf32> to vector<384x128xf32>
    %cst_29 = arith.constant dense<0.000000e+00> : vector<128x128xf32>
    %35 = tpu.matmul %32, %34, %cst_29 {dimension_numbers = #tpu.dot_dimension_numbers<[1], [0], [0], [1], [0, 0, 1, 1], [], []>} : vector<128x384xf32>, vector<384x128xf32>, vector<128x128xf32> -> vector<128x128xf32>
    %c0_30 = arith.constant 0 : index
    %c1_31 = arith.constant 1 : index
    %c0_32 = arith.constant 0 : index
    %c0_33 = arith.constant 0 : index
    %36 = vector.load %arg9[%c0_30, %c1_31, %c0_32, %c0_33] : memref<2x10x8x128xf32, #tpu.memory_space<vmem>>, vector<2x8x8x128xf32>
    %37 = vector.shape_cast %36 : vector<2x8x8x128xf32> to vector<16x8x128xf32>
    %cst_34 = arith.constant 0.000000e+00 : f32
    %38 = vector.broadcast %cst_34 : f32 to vector<16x1x128xf32>
    %39 = vector.extract_strided_slice %37 {offsets = [0, 0, 0], sizes = [16, 7, 128], strides = [1, 1, 1]} : vector<16x8x128xf32> to vector<16x7x128xf32>
    %40 = tpu.concatenate %38, %39 in 1 : vector<16x1x128xf32>, vector<16x7x128xf32> -> vector<16x8x128xf32>
    %cst_35 = arith.constant 0.000000e+00 : f32
    %41 = vector.broadcast %cst_35 : f32 to vector<16x1x128xf32>
    %42 = vector.extract_strided_slice %37 {offsets = [0, 1, 0], sizes = [16, 7, 128], strides = [1, 1, 1]} : vector<16x8x128xf32> to vector<16x7x128xf32>
    %43 = tpu.concatenate %42, %41 in 1 : vector<16x7x128xf32>, vector<16x1x128xf32> -> vector<16x8x128xf32>
    %44 = tpu.concatenate %40, %37, %43 in 2 : vector<16x8x128xf32>, vector<16x8x128xf32>, vector<16x8x128xf32> -> vector<16x8x384xf32>
    %45 = vector.shape_cast %44 : vector<16x8x384xf32> to vector<128x384xf32>
    %c1_36 = arith.constant 1 : index
    %c0_37 = arith.constant 0 : index
    %c0_38 = arith.constant 0 : index
    %46 = vector.load %arg3[%c1_36, %c0_37, %c0_38] : memref<3x384x128xf32, #tpu.memory_space<vmem>>, vector<1x384x128xf32>
    %47 = vector.shape_cast %46 : vector<1x384x128xf32> to vector<384x128xf32>
    %cst_39 = arith.constant dense<0.000000e+00> : vector<128x128xf32>
    %48 = tpu.matmul %45, %47, %cst_39 {dimension_numbers = #tpu.dot_dimension_numbers<[1], [0], [0], [1], [0, 0, 1, 1], [], []>} : vector<128x384xf32>, vector<384x128xf32>, vector<128x128xf32> -> vector<128x128xf32>
    %49 = arith.addf %35, %48 : vector<128x128xf32>
    %c0_40 = arith.constant 0 : index
    %c2 = arith.constant 2 : index
    %c0_41 = arith.constant 0 : index
    %c0_42 = arith.constant 0 : index
    %50 = vector.load %arg9[%c0_40, %c2, %c0_41, %c0_42] : memref<2x10x8x128xf32, #tpu.memory_space<vmem>>, vector<2x8x8x128xf32>
    %51 = vector.shape_cast %50 : vector<2x8x8x128xf32> to vector<16x8x128xf32>
    %cst_43 = arith.constant 0.000000e+00 : f32
    %52 = vector.broadcast %cst_43 : f32 to vector<16x1x128xf32>
    %53 = vector.extract_strided_slice %51 {offsets = [0, 0, 0], sizes = [16, 7, 128], strides = [1, 1, 1]} : vector<16x8x128xf32> to vector<16x7x128xf32>
    %54 = tpu.concatenate %52, %53 in 1 : vector<16x1x128xf32>, vector<16x7x128xf32> -> vector<16x8x128xf32>
    %cst_44 = arith.constant 0.000000e+00 : f32
    %55 = vector.broadcast %cst_44 : f32 to vector<16x1x128xf32>
    %56 = vector.extract_strided_slice %51 {offsets = [0, 1, 0], sizes = [16, 7, 128], strides = [1, 1, 1]} : vector<16x8x128xf32> to vector<16x7x128xf32>
    %57 = tpu.concatenate %56, %55 in 1 : vector<16x7x128xf32>, vector<16x1x128xf32> -> vector<16x8x128xf32>
    %58 = tpu.concatenate %54, %51, %57 in 2 : vector<16x8x128xf32>, vector<16x8x128xf32>, vector<16x8x128xf32> -> vector<16x8x384xf32>
    %59 = vector.shape_cast %58 : vector<16x8x384xf32> to vector<128x384xf32>
    %c2_45 = arith.constant 2 : index
    %c0_46 = arith.constant 0 : index
    %c0_47 = arith.constant 0 : index
    %60 = vector.load %arg3[%c2_45, %c0_46, %c0_47] : memref<3x384x128xf32, #tpu.memory_space<vmem>>, vector<1x384x128xf32>
    %61 = vector.shape_cast %60 : vector<1x384x128xf32> to vector<384x128xf32>
    %cst_48 = arith.constant dense<0.000000e+00> : vector<128x128xf32>
    %62 = tpu.matmul %59, %61, %cst_48 {dimension_numbers = #tpu.dot_dimension_numbers<[1], [0], [0], [1], [0, 0, 1, 1], [], []>} : vector<128x384xf32>, vector<384x128xf32>, vector<128x128xf32> -> vector<128x128xf32>
    %63 = arith.addf %49, %62 : vector<128x128xf32>
    %c0_49 = arith.constant 0 : index
    %c0_50 = arith.constant 0 : index
    %64 = vector.load %arg6[%c0_49, %c0_50] : memref<1x128xf32, #tpu.memory_space<vmem>>, vector<1x128xf32>
    %65 = vector.broadcast %64 : vector<1x128xf32> to vector<128x128xf32>
    %66 = arith.addf %63, %65 : vector<128x128xf32>
    %cst_51 = arith.constant 0.000000e+00 : f32
    %67 = vector.broadcast %cst_51 : f32 to vector<128x128xf32>
    %68 = arith.cmpf ogt, %66, %67 : vector<128x128xf32>
    %cst_52 = arith.constant 2.000000e-01 : f32
    %69 = vector.broadcast %cst_52 : f32 to vector<128x128xf32>
    %70 = arith.mulf %69, %66 : vector<128x128xf32>
    %71 = arith.select %68, %66, %70 : vector<128x128xi1>, vector<128x128xf32>
    %72 = vector.extract_strided_slice %0 {offsets = [0, 0, 0, 12], sizes = [2, 8, 8, 4], strides = [1, 1, 1, 1]} : vector<2x9x9x16xf32> to vector<2x8x8x4xf32>
    %73 = vector.shape_cast %72 : vector<2x8x8x4xf32> to vector<128x4xf32>
    %c0_53 = arith.constant 0 : index
    %c0_54 = arith.constant 0 : index
    %74 = vector.load %arg4[%c0_53, %c0_54] : memref<4x128xf32, #tpu.memory_space<vmem>>, vector<4x128xf32>
    %cst_55 = arith.constant dense<0.000000e+00> : vector<128x128xf32>
    %75 = tpu.matmul %73, %74, %cst_55 {dimension_numbers = #tpu.dot_dimension_numbers<[1], [0], [0], [1], [0, 0, 1, 1], [], []>} : vector<128x4xf32>, vector<4x128xf32>, vector<128x128xf32> -> vector<128x128xf32>
    %76 = arith.addf %71, %75 : vector<128x128xf32>
    %c0_56 = arith.constant 0 : index
    %c0_57 = arith.constant 0 : index
    %77 = vector.load %arg7[%c0_56, %c0_57] : memref<1x128xf32, #tpu.memory_space<vmem>>, vector<1x128xf32>
    %78 = vector.broadcast %77 : vector<1x128xf32> to vector<128x128xf32>
    %79 = arith.addf %76, %78 : vector<128x128xf32>
    %80 = vector.shape_cast %79 : vector<128x128xf32> to vector<2x8x8x128xf32>
    %c0_58 = arith.constant 0 : index
    %c0_59 = arith.constant 0 : index
    %c0_60 = arith.constant 0 : index
    %c0_61 = arith.constant 0 : index
    %81 = vector.load %arg8[%c0_58, %c0_59, %c0_60, %c0_61] : memref<2x8x8x128xf32, #tpu.memory_space<vmem>>, vector<2x8x8x128xf32>
    tpu.vector_store %arg8[%c0_58, %c0_59, %c0_60, %c0_61], %80 {strides = array<i32>} : memref<2x8x8x128xf32, #tpu.memory_space<vmem>>, vector<2x8x8x128xf32>,
    return
  }
  func.func @transform_0(%arg0: i32) -> (i32, i32, i32, i32) {
    %c0_i32 = arith.constant 0 : i32
    %c0_i32_0 = arith.constant 0 : i32
    %c0_i32_1 = arith.constant 0 : i32
    %c0_i32_2 = arith.constant 0 : i32
    return %arg0, %c0_i32, %c0_i32_0, %c0_i32_1 : i32, i32, i32, i32
  }
  func.func @transform_1(%arg0: i32) -> (i32, i32) {
    %c0_i32 = arith.constant 0 : i32
    %c0_i32_0 = arith.constant 0 : i32
    %c0_i32_1 = arith.constant 0 : i32
    return %c0_i32, %c0_i32_0 : i32, i32
  }
  func.func @transform_2(%arg0: i32) -> (i32, i32, i32) {
    %c0_i32 = arith.constant 0 : i32
    %c0_i32_0 = arith.constant 0 : i32
    %c0_i32_1 = arith.constant 0 : i32
    %c0_i32_2 = arith.constant 0 : i32
    return %c0_i32, %c0_i32_0, %c0_i32_1 : i32, i32, i32
  }
  func.func @transform_3(%arg0: i32) -> (i32, i32) {
    %c0_i32 = arith.constant 0 : i32
    %c0_i32_0 = arith.constant 0 : i32
    %c0_i32_1 = arith.constant 0 : i32
    return %c0_i32, %c0_i32_0 : i32, i32
  }
  func.func @transform_4(%arg0: i32) -> (i32, i32) {
    %c0_i32 = arith.constant 0 : i32
    %c0_i32_0 = arith.constant 0 : i32
    %c0_i32_1 = arith.constant 0 : i32
    return %c0_i32, %c0_i32_0 : i32, i32
  }
  func.func @transform_5(%arg0: i32) -> (i32, i32) {
    %c0_i32 = arith.constant 0 : i32
    %c0_i32_0 = arith.constant 0 : i32
    %c0_i32_1 = arith.constant 0 : i32
    return %c0_i32, %c0_i32_0 : i32, i32
  }
  func.func @transform_6(%arg0: i32) -> (i32, i32) {
    %c0_i32 = arith.constant 0 : i32
    %c0_i32_0 = arith.constant 0 : i32
    %c0_i32_1 = arith.constant 0 : i32
    return %c0_i32, %c0_i32_0 : i32, i32
  }
  func.func @transform_7(%arg0: i32) -> (i32, i32, i32, i32) {
    %c0_i32 = arith.constant 0 : i32
    %c0_i32_0 = arith.constant 0 : i32
    %c0_i32_1 = arith.constant 0 : i32
    %c0_i32_2 = arith.constant 0 : i32
    return %arg0, %c0_i32, %c0_i32_0, %c0_i32_1 : i32, i32, i32, i32
  }
}

</mosaic_0001>

<bundles_post_ra>
// kernel: _forward.1
= control target key start
LH: loop header
LB: loop body
LE: loop exit
PB: predicated region body
PF: predicated region fallthrough
CT: control target
= control target key end

     0   :  { %vm94_vm0 = vcmask 1046528   ;;  %s3372_s9 = smov 12   ;;  %s3373_s10 = smov 16   ;;  %vm474_vm1 = vcmask 1043456   ;;  %vm345_vm2 = vcmask 130048   ;;  %vm362_vm3 = vcmask 162816   ;;  %s4999_s0 = inlined_call_operand.vmem [shape: f32[2,9,9,16], index: 0, kind: input, shape index: {}]   ;;  %s5000_s1 = inlined_call_operand.vmem [shape: f32[36,128], index: 1, kind: input, shape index: {}]   ;;  %s5001_s2 = inlined_call_operand.vmem [shape: f32[3,384,128], index: 2, kind: input, shape index: {}]   ;;  %s5002_s4 = inlined_call_operand.vmem [shape: f32[1,128], index: 4, kind: input, shape index: {}]   ;;  %s5003_s3 = inlined_call_operand.vmem [shape: f32[4,128], index: 3, kind: input, shape index: {}]   ;;  %s5004_s5 = inlined_call_operand.vmem [shape: f32[1,128], index: 5, kind: input, shape index: {}]   ;;  %s5005_s6 = inlined_call_operand.vmem [shape: f32[1,128], index: 6, kind: input, shape index: {}]   ;;  %s5006_s7 = inlined_call_operand.vmem [shape: f32[2,8,8,128], index: 7, kind: output, shape index: {}]  }
   0x1   :  { %v3421_v0 = vld [vmem:[%s4999_s0] sm:$0xff]  ;;  %v27_v1 = vld [vmem:[%s4999_s0 + $0x8] sm:$0x1]  ;;  %v3429_v2 = vld [vmem:[%s4999_s0 + $0x10] sm:$0xff]  ;;  %s3374_s19 = smov 24   ;;  %s3375_s24 = smov 32  }
   0x2   :  { %v95_v3 = vrot.slane %v3421_v0, 1  ;;  %v96_v4 = vrot.slane %v27_v1, 1  ;;  %v29_v5 = vld [vmem:[%s4999_s0 + $0x18] sm:$0x1]  ;;  %v98_v6 = vrot.slane %v3429_v2, 1  ;;  %v3443_v10 = vld [vmem:[%s4999_s0 + $0x20] sm:$0xff] }
   0x3   :  { %v99_v7 = vrot.slane %v29_v5, 1  ;;  %v31_v11 = vld [vmem:[%s4999_s0 + $0x28] sm:$0x1]  ;;  %v101_v12 = vrot.slane %v3443_v10, 1  ;;  %v3454_v14 = vld [vmem:[%s4999_s0 + $0x30] sm:$0xff]  ;;  %v416_v20 = vld [vmem:[%s5000_s1 + $0x18] sm:$0xff] }
   0x4   :  { %v97_v8 = vsel %vm94_vm0, %v95_v3, %v96_v4  ;;  %v102_v13 = vrot.slane %v31_v11, 1  ;;  %v33_v15 = vld [vmem:[%s4999_s0 + $0x38] sm:$0x1]  ;;  %v104_v17 = vrot.slane %v3454_v14, 1  ;;  %v417_v19 = vld [vmem:[%s5000_s1 + $0x20] sm:$0xf] }
   0x5   :  { %191 = vrot.lane.b32.xlu1 %v97_v8, %s3372_s9  ;;  %143 = vrot.lane.b32.xlu0 %v97_v8, %s3373_s10  ;;  %v100_v9 = vsel %vm94_vm0, %v98_v6, %v99_v7  ;;  %v105_v18 = vrot.slane %v33_v15, 1  ;;  %v415_v22 = vld [vmem:[%s5000_s1 + $0x10] sm:$0xff]  ;;  %v414_v23 = vld [vmem:[%s5000_s1 + $0x8] sm:$0xff]  ;;  %vm379_vm4 = vcmask 195584   ;;  %vm396_vm5 = vcmask 261120   ;;  %s3376_s27 = smov 116  }
   0x6   :  { %v103_v16 = vsel %vm94_vm0, %v101_v12, %v102_v13  ;;  %3106 = vmatprep.subr.msk.mxu0 %vm474_vm1, %v417_v19  ;;  %v3487_v24 = vld [vmem:[%s4999_s0 + $0x40] sm:$0xff]  ;;  %v35_v25 = vld [vmem:[%s4999_s0 + $0x48] sm:$0x1]  ;;  %v3501_v29 = vld [vmem:[%s4999_s0 + $0x50] sm:$0xff]  ;;  %vm425_vm6 = vcmask 293888   ;;  %vm757_vm8 = vcmask 1040384  }
   0x7   :  { %v106_v21 = vsel %vm94_vm0, %v104_v17, %v105_v18  ;;  %3107 = vmatpush3.msk.msra.mxu0 %vm474_vm1, %v417_v19  ;;  %v413_v26 = vld [vmem:[%s5000_s1] sm:$0xff]  ;;  %v107_v27 = vrot.slane %v3487_v24, 1  ;;  %v108_v28 = vrot.slane %v35_v25, 1  ;;  %v37_v30 = vld [vmem:[%s4999_s0 + $0x58] sm:$0x1]  ;;  %v110_v32 = vrot.slane %v3501_v29, 1  ;;  %vm3960_vm10 = vmneg %vm757_vm8 }
   0x8   :  { %3108 = vmatprep.subr.mxu0 %v416_v20  ;;  %v111_v33 = vrot.slane %v37_v30, 1  ;;  %v3520_v35 = vld [vmem:[%s4999_s0 + $0x60] sm:$0xff]  ;;  %v39_v36 = vld [vmem:[%s4999_s0 + $0x68] sm:$0x1]  ;;  %v3531_v39 = vld [vmem:[%s4999_s0 + $0x70] sm:$0xff] }
   0x9   :  { %193 = vrot.lane.b32.xlu1 %v100_v9, %s3372_s9  ;;  %145 = vrot.lane.b32.xlu0 %v100_v9, %s3373_s10  ;;  %v109_v31 = vsel %vm94_vm0, %v107_v27, %v108_v28  ;;  %v113_v37 = vrot.slane %v3520_v35, 1  ;;  %v114_v38 = vrot.slane %v39_v36, 1  ;;  %v41_v40 = vld [vmem:[%s4999_s0 + $0x78] sm:$0x1]  ;;  %v116_v42 = vrot.slane %v3531_v39, 1  ;;  %v42_v45 = vld [vmem:[%s4999_s0 + $0x80] sm:$0xff] }
   0xa   :  { %3109 = vmatpush3.msra.mxu0 %v416_v20  ;;  %v112_v34 = vsel %vm94_vm0, %v110_v32, %v111_v33  ;;  %v117_v43 = vrot.slane %v41_v40, 1  ;;  %v43_v46 = vld [vmem:[%s4999_s0 + $0x88] sm:$0x1]  ;;  %v291_v47 = vrot.slane %v42_v45, 1  ;;  %v3558_v49 = vld [vmem:[%s4999_s0 + $0xa0] sm:$0xff]  ;;  %v3566_v51 = vld [vmem:[%s4999_s0 + $0x90] sm:$0xff] }
   0xb   :  { %3110 = vmatprep.subr.mxu0 %v415_v22  ;;  %v115_v41 = vsel %vm94_vm0, %v113_v37, %v114_v38  ;;  %v292_v48 = vrot.slane %v43_v46, 1  ;;  %v47_v50 = vld [vmem:[%s4999_s0 + $0xa8] sm:$0x1]  ;;  %v45_v52 = vld [vmem:[%s4999_s0 + $0x98] sm:$0x1]  ;;  %v122_v53 = vrot.slane %v3558_v49, 1 }
   0xc   :  { %3111 = vmatpush3.msra.mxu0 %v415_v22  ;;  %v118_v44 = vsel %vm94_vm0, %v116_v42, %v117_v43  ;;  %v123_v55 = vrot.slane %v47_v50, 1  ;;  %v119_v56 = vrot.slane %v3566_v51, 1  ;;  %v120_v57 = vrot.slane %v45_v52, 1  ;;  %v3586_v60 = vld [vmem:[%s4999_s0 + $0xb0] sm:$0xff]  ;;  %v49_v61 = vld [vmem:[%s4999_s0 + $0xb8] sm:$0x1] }
   0xd   :  { %243 = vrot.lane.b32.xlu1 %v3443_v10, %s3374_s19  ;;  %241 = vrot.lane.b32.xlu0 %v3429_v2, %s3374_s19  ;;  %v293_v54 = vsel %vm94_vm0, %v291_v47, %v292_v48  ;;  %v125_v62 = vrot.slane %v3586_v60, 1  ;;  %v126_v63 = vrot.slane %v49_v61, 1  ;;  %v3597_v1 = vld [vmem:[%s4999_s0 + $0xc0] sm:$0xff]  ;;  %v51_v3 = vld [vmem:[%s4999_s0 + $0xc8] sm:$0x1] }
   0xe   :  { %3112 = vmatprep.subr.mxu0 %v414_v23  ;;  %v124_v58 = vsel %vm94_vm0, %v122_v53, %v123_v55  ;;  %v121_v59 = vsel %vm94_vm0, %v119_v56, %v120_v57  ;;  %v128_v5 = vrot.slane %v3597_v1, 1  ;;  %v129_v6 = vrot.slane %v51_v3, 1  ;;  %v3616_v8 = vld [vmem:[%s4999_s0 + $0xd0] sm:$0xff]  ;;  %v3627_v13 = vld [vmem:[%s4999_s0 + $0xe0] sm:$0xff]  ;;  %v55_v15 = vld [vmem:[%s4999_s0 + $0xe8] sm:$0x1] }
   0xf   :  { %3113 = vmatpush3.msra.mxu0 %v414_v23  ;;  %v127_v4 = vsel %vm94_vm0, %v125_v62, %v126_v63  ;;  %v131_v11 = vrot.slane %v3616_v8, 1  ;;  %v134_v17 = vrot.slane %v3627_v13, 1  ;;  %v135_v18 = vrot.slane %v55_v15, 1  ;;  %v3646_v20 = vld [vmem:[%s4999_s0 + $0xf0] sm:$0xff]  ;;  %v3657_v25 = vld [vmem:[%s4999_s0 + $0x100] sm:$0xff]  ;;  %v2504_v37 = vld [vmem:[%s5001_s2 + $0x278] sm:$0xff] }
  0x10   :  { %3114 = vmatprep.subr.mxu0 %v413_v26  ;;  %v130_v7 = vsel %vm94_vm0, %v128_v5, %v129_v6  ;;  %v137_v22 = vrot.slane %v3646_v20, 1  ;;  %v140_v28 = vrot.slane %v3657_v25, 1  ;;  %v60_v32 = vld [vmem:[%s4999_s0 + $0x110] sm:$0xff]  ;;  %v61_v33 = vld [vmem:[%s4999_s0 + $0x118] sm:$0x1]  ;;  %2753 = vmatprep.subr.mxu1 %v2504_v37  ;;  %v2502_v47 = vld [vmem:[%s5001_s2 + $0x268] sm:$0xff] }
  0x11   :  { %299 = vrot.lane.b32.xlu1 %v103_v16, %s3375_s24  ;;  %297 = vrot.lane.b32.xlu0 %v100_v9, %s3375_s24  ;;  %v53_v9 = vld [vmem:[%s4999_s0 + $0xd8] sm:$0x1]  ;;  %v136_v19 = vsel %vm94_vm0, %v134_v17, %v135_v18  ;;  %v2487_v42 = vld [vmem:[%s5001_s2 + $0x1f0] sm:$0xff]  ;;  %v294_v43 = vrot.slane %v60_v32, 1 }
  0x12   :  { %3115 = vmatpush3.msra.mxu0 %v413_v26  ;;  %v132_v12 = vrot.slane %v53_v9, 1  ;;  %v59_v26 = vld [vmem:[%s4999_s0 + $0x108] sm:$0x1]  ;;  %v2488_v38 = vld [vmem:[%s5001_s2 + $0x1f8] sm:$0xff]  ;;  %v2501_v50 = vld [vmem:[%s5001_s2 + $0x260] sm:$0xff] }
  0x13   :  { %v141_v30 = vrot.slane %v59_v26, 1  ;;  %v2520_v40 = vld [vmem:[%s5001_s2 + $0x2f8] sm:$0xff]  ;;  %2754 = vmatpush3.msra.mxu1 %v2488_v38  ;;  %v2486_v48 = vld [vmem:[%s5001_s2 + $0x1e8] sm:$0xff]  ;;  %v2485_v57 = vld [vmem:[%s5001_s2 + $0x1e0] sm:$0xff] }
  0x14   :  { %3140 = vmatprep.subr.mxu0 %v2520_v40  ;;  %v2499_v63 = vld [vmem:[%s5001_s2 + $0x250] sm:$0xff]  ;;  %v2497_v17 = vld [vmem:[%s5001_s2 + $0x240] sm:$0xff]  ;;  %v2478_v37 = vld [vmem:[%s5001_s2 + $0x1a8] sm:$0xff] }
  0x15   :  { %149 = vrot.lane.b32.xlu1 %v106_v21, %s3373_s10  ;;  %147 = vrot.lane.b32.xlu0 %v103_v16, %s3373_s10  ;;  %v2519_v15 = vld [vmem:[%s5001_s2 + $0x2f0] sm:$0xff]  ;;  %v2517_v26 = vld [vmem:[%s5001_s2 + $0x2e0] sm:$0xff] }
  0x19   :  { %197 = vrot.lane.b32.xlu1 %v106_v21, %s3372_s9  ;;  %195 = vrot.lane.b32.xlu0 %v103_v16, %s3372_s9  ;;  %v133_v16 = vsel %vm94_vm0, %v131_v11, %v132_v12  ;;  %v2498_v12 = vld [vmem:[%s5001_s2 + $0x248] sm:$0xff] }
  0x1d   :  { %247 = vrot.lane.b32.xlu1 %v3487_v24, %s3374_s19  ;;  %245 = vrot.lane.b32.xlu0 %v3454_v14, %s3374_s19 }
  0x21   :  { %303 = vrot.lane.b32.xlu1 %v109_v31, %s3375_s24  ;;  %301 = vrot.lane.b32.xlu0 %v106_v21, %s3375_s24  ;;  %v57_v21 = vld [vmem:[%s4999_s0 + $0xf8] sm:$0x1] }
  0x22   :  { %v138_v23 = vrot.slane %v57_v21, 1  ;;  %v2518_v21 = vld [vmem:[%s5001_s2 + $0x2e8] sm:$0xff] }
  0x24   :  { %v139_v27 = vsel %vm94_vm0, %v137_v22, %v138_v23  ;;  %v2481_v22 = vld [vmem:[%s5001_s2 + $0x1c0] sm:$0xff]  ;;  %v2496_v23 = vld [vmem:[%s5001_s2 + $0x238] sm:$0xff] }
  0x25   :  { %153 = vrot.lane.b32.xlu1 %v112_v34, %s3373_s10  ;;  %151 = vrot.lane.b32.xlu0 %v109_v31, %s3373_s10 }
  0x29   :  { %201 = vrot.lane.b32.xlu1 %v112_v34, %s3372_s9  ;;  %199 = vrot.lane.b32.xlu0 %v109_v31, %s3372_s9  ;;  %v142_v31 = vsel %vm94_vm0, %v140_v28, %v141_v30  ;;  %v2495_v28 = vld [vmem:[%s5001_s2 + $0x230] sm:$0xff] }
  0x2d   :  { %251 = vrot.lane.b32.xlu1 %v3520_v35, %s3374_s19  ;;  %249 = vrot.lane.b32.xlu0 %v3501_v29, %s3374_s19 }
  0x31   :  { %307 = vrot.lane.b32.xlu1 %v115_v41, %s3375_s24  ;;  %305 = vrot.lane.b32.xlu0 %v112_v34, %s3375_s24 }
  0x35   :  { %157 = vrot.lane.b32.xlu1 %v118_v44, %s3373_s10  ;;  %155 = vrot.lane.b32.xlu0 %v115_v41, %s3373_s10 }
  0x39   :  { %205 = vrot.lane.b32.xlu1 %v118_v44, %s3372_s9  ;;  %203 = vrot.lane.b32.xlu0 %v115_v41, %s3372_s9  ;;  %v2503_v41 = vld [vmem:[%s5001_s2 + $0x270] sm:$0xff] }
  0x3a   :  { %2755 = vmatprep.subr.mxu1 %v2503_v41  ;;  %v2514_v41 = vld [vmem:[%s5001_s2 + $0x2c8] sm:$0xff] }
  0x3b   :  { %2756 = vmatpush3.msra.mxu1 %v2487_v42 }
  0x3c   :  { %2757 = vmatprep.subr.mxu1 %v2502_v47 }
  0x3d   :  { %255 = vrot.lane.b32.xlu1 %v42_v45, %s3374_s19  ;;  %253 = vrot.lane.b32.xlu0 %v3531_v39, %s3374_s19 }
  0x3e   :  { %2758 = vmatpush3.msra.mxu1 %v2486_v48 }
  0x3f   :  { %2759 = vmatprep.subr.mxu1 %v2501_v50 }
  0x40   :  { %2760 = vmatpush3.msra.mxu1 %v2485_v57 }
  0x41   :  { %311 = vrot.lane.b32.xlu1 %v293_v54, %s3375_s24  ;;  %309 = vrot.lane.b32.xlu0 %v118_v44, %s3375_s24  ;;  %v295_v44 = vrot.slane %v61_v33, 1  ;;  %v2479_v33 = vld [vmem:[%s5001_s2 + $0x1b0] sm:$0xff] }
  0x43   :  { %v296_v52 = vsel %vm94_vm0, %v294_v43, %v295_v44  ;;  %v2513_v44 = vld [vmem:[%s5001_s2 + $0x2c0] sm:$0xff] }
  0x45   :  { %161 = vrot.lane.b32.xlu1 %v124_v58, %s3373_s10  ;;  %159 = vrot.lane.b32.xlu0 %v121_v59, %s3373_s10 }
  0x49   :  { %209 = vrot.lane.b32.xlu1 %v124_v58, %s3372_s9  ;;  %207 = vrot.lane.b32.xlu0 %v121_v59, %s3372_s9  ;;  %v2484_v59 = vld [vmem:[%s5001_s2 + $0x1d8] sm:$0xff] }
  0x4d   :  { %259 = vrot.lane.b32.xlu1 %v3586_v60, %s3374_s19  ;;  %257 = vrot.lane.b32.xlu0 %v3558_v49, %s3374_s19 }
  0x51   :  { %163 = vrot.lane.b32.xlu1 %v127_v4, %s3373_s10  ;;  %313 = vrot.lane.b32.xlu0 %v124_v58, %s3375_s24  ;;  %v2500_v58 = vld [vmem:[%s5001_s2 + $0x258] sm:$0xff] }
  0x52   :  { %2761 = vmatprep.subr.mxu1 %v2500_v58 }
  0x53   :  { %2762 = vmatpush3.msra.mxu1 %v2484_v59  ;;  %v2510_v59 = vld [vmem:[%s5001_s2 + $0x2a8] sm:$0xff] }
  0x54   :  { %2763 = vmatprep.subr.mxu1 %v2499_v63 }
  0x55   :  { %165 = vrot.lane.b32.xlu1 %v130_v7, %s3373_s10  ;;  %315 = vrot.lane.b32.xlu0 %v127_v4, %s3375_s24 }
  0x59   :  { %213 = vrot.lane.b32.xlu1 %v130_v7, %s3372_s9  ;;  %211 = vrot.lane.b32.xlu0 %v127_v4, %s3372_s9 }
  0x5d   :  { %263 = vrot.lane.b32.xlu1 %v3616_v8, %s3374_s19  ;;  %261 = vrot.lane.b32.xlu0 %v3597_v1, %s3374_s19 }
  0x61   :  { %167 = vrot.lane.b32.xlu1 %v133_v16, %s3373_s10  ;;  %317 = vrot.lane.b32.xlu0 %v130_v7, %s3375_s24  ;;  %v2483_v7 = vld [vmem:[%s5001_s2 + $0x1d0] sm:$0xff] }
  0x62   :  { %2764 = vmatpush3.msra.mxu1 %v2483_v7 }
  0x63   :  { %2765 = vmatprep.subr.mxu1 %v2498_v12 }
  0x65   :  { %169 = vrot.lane.b32.xlu1 %v136_v19, %s3373_s10  ;;  %319 = vrot.lane.b32.xlu0 %v133_v16, %s3375_s24 }
  0x69   :  { %217 = vrot.lane.b32.xlu1 %v136_v19, %s3372_s9  ;;  %215 = vrot.lane.b32.xlu0 %v133_v16, %s3372_s9  ;;  %v2482_v16 = vld [vmem:[%s5001_s2 + $0x1c8] sm:$0xff] }
  0x6a   :  { %2766 = vmatpush3.msra.mxu1 %v2482_v16 }
  0x6b   :  { %2767 = vmatprep.subr.mxu1 %v2497_v17 }
  0x6c   :  { %2768 = vmatpush3.msra.mxu1 %v2481_v22 }
  0x6d   :  { %267 = vrot.lane.b32.xlu1 %v3646_v20, %s3374_s19  ;;  %265 = vrot.lane.b32.xlu0 %v3627_v13, %s3374_s19 }
  0x6e   :  { %2769 = vmatprep.subr.mxu1 %v2496_v23 }
  0x71   :  { %171 = vrot.lane.b32.xlu1 %v139_v27, %s3373_s10  ;;  %321 = vrot.lane.b32.xlu0 %v136_v19, %s3375_s24 }
  0x75   :  { %173 = vrot.lane.b32.xlu1 %v142_v31, %s3373_s10  ;;  %323 = vrot.lane.b32.xlu0 %v139_v27, %s3375_s24 }
  0x77   :  { %v192_v34 = vpop.permute.xlu1 %191  ;;  %v144_v36 = vpop.permute.xlu0 %143 }
  0x78   :  { %v346_v53 = vsel %vm345_vm2, %v3421_v0, %v144_v36  ;;  %v2515_v36 = vld [vmem:[%s5001_s2 + $0x2d0] sm:$0xff] }
  0x79   :  { %221 = vrot.lane.b32.xlu1 %v142_v31, %s3372_s9  ;;  %219 = vrot.lane.b32.xlu0 %v139_v27, %s3372_s9  ;;  %v363_v62 = vsel %vm362_vm3, %v346_v53, %v192_v34  ;;  %v2480_v27 = vld [vmem:[%s5001_s2 + $0x1b8] sm:$0xff]  ;;  %v2494_v34 = vld [vmem:[%s5001_s2 + $0x228] sm:$0xff] }
  0x7a   :  { %2770 = vmatpush3.msra.mxu1 %v2480_v27  ;;  %v2512_v53 = vld [vmem:[%s5001_s2 + $0x2b8] sm:$0xff] }
  0x7b   :  { %v194_v45 = vpop.permute.xlu1 %193  ;;  %v146_v46 = vpop.permute.xlu0 %145  ;;  %2771 = vmatprep.subr.mxu1 %v2495_v28 }
  0x7c   :  { %v347_v54 = vsel %vm345_vm2, %v3429_v2, %v146_v46  ;;  %2772 = vmatpush3.msra.mxu1 %v2479_v33 }
  0x7d   :  { %271 = vrot.lane.b32.xlu1 %v60_v32, %s3374_s19  ;;  %269 = vrot.lane.b32.xlu0 %v3657_v25, %s3374_s19  ;;  %v364_v61 = vsel %vm362_vm3, %v347_v54, %v194_v45  ;;  %v2516_v32 = vld [vmem:[%s5001_s2 + $0x2d8] sm:$0xff] }
  0x7e   :  { %2773 = vmatprep.subr.mxu1 %v2494_v34 }
  0x7f   :  { %v244_v55 = vpop.permute.xlu1 %243  ;;  %v242_v56 = vpop.permute.xlu0 %241  ;;  %2774 = vmatpush3.msra.mxu1 %v2478_v37 }
  0x80   :  { %v381_v3 = vsel %vm379_vm4, %v364_v61, %v244_v55  ;;  %v380_v4 = vsel %vm379_vm4, %v363_v62, %v242_v56  ;;  %v2511_v56 = vld [vmem:[%s5001_s2 + $0x2b0] sm:$0xff] }
  0x81   :  { %327 = vrot.lane.b32.xlu1 %v296_v52, %s3375_s24  ;;  %325 = vrot.lane.b32.xlu0 %v142_v31, %s3375_s24 }
  0x83   :  { %v300_v5 = vpop.permute.xlu1 %299  ;;  %v298_v6 = vpop.permute.xlu0 %297 }
  0x84   :  { %v398_v9 = vsel %vm396_vm5, %v381_v3, %v300_v5  ;;  %v397_v11 = vsel %vm396_vm5, %v380_v4, %v298_v6 }
  0x85   :  { %3116 = vmatprep.mubr.msk.f32.mxu0 %vm425_vm6, %v397_v11  ;;  %2183 = vrot.lane.b32.xlu0 %v3421_v0, %s3376_s27  ;;  %v3948_v0 = vld [vmem:[%s5002_s4] ss:$0 sm:$0xff] }
  0x86   :  { %3117 = vmatmul.mubr.msk.f32.vlgmr.msra.gmra.mxu0 %vm425_vm6, %v398_v9  ;;  %2185 = vrot.lane.b32.xlu1 %v3429_v2, %s3376_s27 }
  0x87   :  { %v150_v18 = vpop.permute.xlu1 %149  ;;  %v148_v19 = vpop.permute.xlu0 %147  ;;  %3141 = vmatpush3.msra.mxu0 %v2520_v40 }
  0x88   :  { %3142 = vmatprep.subr.mxu0 %v2519_v15  ;;  %v349_v42 = vsel %vm345_vm2, %v3454_v14, %v150_v18  ;;  %v348_v43 = vsel %vm345_vm2, %v3443_v10, %v148_v19 }
  0x89   :  { %3143 = vmatpush3.msra.mxu0 %v2519_v15  ;;  %2187 = vrot.lane.b32.xlu0 %v3443_v10, %s3376_s27 }
  0x8a   :  { %3144 = vmatprep.subr.mxu0 %v2518_v21  ;;  %2189 = vrot.lane.b32.xlu1 %v3454_v14, %s3376_s27 }
  0x8b   :  { %v198_v30 = vpop.permute.xlu1 %197  ;;  %v196_v31 = vpop.permute.xlu0 %195  ;;  %3145 = vmatpush3.msra.mxu0 %v2518_v21 }
  0x8c   :  { %3146 = vmatprep.subr.mxu0 %v2517_v26  ;;  %v366_v45 = vsel %vm362_vm3, %v349_v42, %v198_v30  ;;  %v365_v46 = vsel %vm362_vm3, %v348_v43, %v196_v31 }
  0x8d   :  { %3147 = vmatpush3.msra.mxu0 %v2517_v26  ;;  %2191 = vrot.lane.b32.xlu0 %v3487_v24, %s3376_s27 }
  0x8e   :  { %3148 = vmatprep.subr.mxu0 %v2516_v32  ;;  %2193 = vrot.lane.b32.xlu1 %v3501_v29, %s3376_s27 }
  0x8f   :  { %v248_v38 = vpop.permute.xlu1 %247  ;;  %v246_v40 = vpop.permute.xlu0 %245  ;;  %3149 = vmatpush3.msra.mxu0 %v2516_v32 }
  0x90   :  { %3150 = vmatprep.subr.mxu0 %v2515_v36  ;;  %v383_v47 = vsel %vm379_vm4, %v366_v45, %v248_v38  ;;  %v382_v48 = vsel %vm379_vm4, %v365_v46, %v246_v40 }
  0x91   :  { %3151 = vmatpush3.msra.mxu0 %v2515_v36  ;;  %2195 = vrot.lane.b32.xlu0 %v3520_v35, %s3376_s27 }
  0x92   :  { %3152 = vmatprep.subr.mxu0 %v2514_v41  ;;  %2197 = vrot.lane.b32.xlu1 %v3531_v39, %s3376_s27 }
  0x93   :  { %v304_v50 = vpop.permute.xlu1 %303  ;;  %v302_v52 = vpop.permute.xlu0 %301  ;;  %3153 = vmatpush3.msra.mxu0 %v2514_v41 }
  0x94   :  { %v400_v54 = vsel %vm396_vm5, %v383_v47, %v304_v50  ;;  %v399_v55 = vsel %vm396_vm5, %v382_v48, %v302_v52  ;;  %3154 = vmatprep.subr.mxu0 %v2513_v44 }
  0x95   :  { %3119 = vmatprep.mubr.msk.f32.mxu0 %vm425_vm6, %v399_v55  ;;  %3155 = vmatpush3.msra.mxu0 %v2513_v44  ;;  %v2493_v55 = vld [vmem:[%s5001_s2 + $0x220] sm:$0xff] }
  0x96   :  { %3120 = vmatmul.mubr.msk.f32.gmra.mxu0 %vm425_vm6, %v400_v54  ;;  %3156 = vmatprep.subr.mxu0 %v2512_v53 }
  0x97   :  { %v154_v57 = vpop.permute.xlu1 %153  ;;  %v152_v58 = vpop.permute.xlu0 %151  ;;  %3157 = vmatpush3.msra.mxu0 %v2512_v53  ;;  %2775 = vmatprep.subr.mxu1 %v2493_v55 }
  0x98   :  { %3158 = vmatprep.subr.mxu0 %v2511_v56  ;;  %v351_v4 = vsel %vm345_vm2, %v3501_v29, %v154_v57  ;;  %v350_v5 = vsel %vm345_vm2, %v3487_v24, %v152_v58  ;;  %v2477_v57 = vld [vmem:[%s5001_s2 + $0x1a0] sm:$0xff]  ;;  %2199 = vrot.lane.b32.xlu0 %v3566_v51, %s3376_s27 }
  0x99   :  { %3159 = vmatpush3.msra.mxu0 %v2511_v56  ;;  %v2509_v58 = vld [vmem:[%s5001_s2 + $0x2a0] sm:$0xff]  ;;  %2776 = vmatpush3.msra.mxu1 %v2477_v57 }
  0x9a   :  { %3160 = vmatprep.subr.mxu0 %v2510_v59  ;;  %2201 = vrot.lane.b32.xlu1 %v3558_v49, %s3376_s27 }
  0x9b   :  { %v202_v61 = vpop.permute.xlu1 %201  ;;  %v200_v62 = vpop.permute.xlu0 %199  ;;  %3161 = vmatpush3.msra.mxu0 %v2510_v59 }
  0x9c   :  { %v368_v6 = vsel %vm362_vm3, %v351_v4, %v202_v61  ;;  %v367_v7 = vsel %vm362_vm3, %v350_v5, %v200_v62  ;;  %3162 = vmatprep.subr.mxu0 %v2509_v58  ;;  %v2476_v4 = vld [vmem:[%s5001_s2 + $0x198] sm:$0xff]  ;;  %2203 = vrot.lane.b32.xlu0 %v3586_v60, %s3376_s27 }
  0x9d   :  { %3163 = vmatpush3.msra.mxu0 %v2509_v58  ;;  %v2508_v5 = vld [vmem:[%s5001_s2 + $0x298] sm:$0xff] }
  0x9e   :  { %3164 = vmatprep.subr.mxu0 %v2508_v5  ;;  %2205 = vrot.lane.b32.xlu1 %v3597_v1, %s3376_s27 }
  0x9f   :  { %v252_v63 = vpop.permute.xlu1 %251  ;;  %v250_v3 = vpop.permute.xlu0 %249  ;;  %3165 = vmatpush3.msra.mxu0 %v2508_v5 }
  0xa0   :  { %v385_v9 = vsel %vm379_vm4, %v368_v6, %v252_v63  ;;  %v384_v11 = vsel %vm379_vm4, %v367_v7, %v250_v3  ;;  %v2492_v63 = vld [vmem:[%s5001_s2 + $0x218] sm:$0xff]  ;;  %v2491_v6 = vld [vmem:[%s5001_s2 + $0x210] sm:$0xff]  ;;  %2207 = vrot.lane.b32.xlu0 %v3616_v8, %s3376_s27 }
  0xa1   :  { %2777 = vmatprep.subr.mxu1 %v2492_v63  ;;  %v2475_v7 = vld [vmem:[%s5001_s2 + $0x190] sm:$0xff] }
  0xa2   :  { %2778 = vmatpush3.msra.mxu1 %v2476_v4  ;;  %2209 = vrot.lane.b32.xlu1 %v3627_v13, %s3376_s27 }
  0xa3   :  { %v308_v12 = vpop.permute.xlu1 %307  ;;  %v306_v15 = vpop.permute.xlu0 %305  ;;  %2779 = vmatprep.subr.mxu1 %v2491_v6 }
  0xa4   :  { %v402_v16 = vsel %vm396_vm5, %v385_v9, %v308_v12  ;;  %v401_v17 = vsel %vm396_vm5, %v384_v11, %v306_v15  ;;  %v2507_v9 = vld [vmem:[%s5001_s2 + $0x290] sm:$0xff]  ;;  %2780 = vmatpush3.msra.mxu1 %v2475_v7  ;;  %v2490_v15 = vld [vmem:[%s5001_s2 + $0x208] sm:$0xff]  ;;  %2211 = vrot.lane.b32.xlu0 %v3646_v20, %s3376_s27 }
  0xa5   :  { %3122 = vmatprep.mubr.msk.f32.mxu0 %vm425_vm6, %v401_v17  ;;  %3166 = vmatprep.subr.mxu0 %v2507_v9  ;;  %v2506_v17 = vld [vmem:[%s5001_s2 + $0x288] sm:$0xff] }
  0xa6   :  { %3123 = vmatmul.mubr.msk.f32.gmra.mxu0 %vm425_vm6, %v402_v16  ;;  %2781 = vmatprep.subr.mxu1 %v2490_v15  ;;  %v2474_v16 = vld [vmem:[%s5001_s2 + $0x188] sm:$0xff] }
  0xa7   :  { %v158_v18 = vpop.permute.xlu1 %157  ;;  %v156_v19 = vpop.permute.xlu0 %155  ;;  %3167 = vmatpush3.msra.mxu0 %v2507_v9  ;;  %2782 = vmatpush3.msra.mxu1 %v2474_v16 }
  0xa8   :  { %v353_v27 = vsel %vm345_vm2, %v3531_v39, %v158_v18  ;;  %v352_v28 = vsel %vm345_vm2, %v3520_v35, %v156_v19  ;;  %v2489_v18 = vld [vmem:[%s5001_s2 + $0x200] sm:$0xff]  ;;  %3168 = vmatprep.subr.mxu0 %v2506_v17  ;;  %2213 = vrot.lane.b32.xlu1 %v3657_v25, %s3376_s27 }
  0xa9   :  { %2783 = vmatprep.subr.mxu1 %v2489_v18  ;;  %v2473_v19 = vld [vmem:[%s5001_s2 + $0x180] sm:$0xff]  ;;  %3169 = vmatpush3.msra.mxu0 %v2506_v17  ;;  %v869_v17 = vld [vmem:[%s5001_s2 + $0x178] sm:$0xff] }
  0xaa   :  { %2784 = vmatpush3.msra.mxu1 %v2473_v19  ;;  %v853_v18 = vld [vmem:[%s5001_s2 + $0xf8] sm:$0xff]  ;;  %v836_v19 = vld [vmem:[%s5001_s2 + $0x70] sm:$0xff] }
  0xab   :  { %v206_v21 = vpop.permute.xlu1 %205  ;;  %v204_v22 = vpop.permute.xlu0 %203  ;;  %3196 = vmatprep.subr.mxu1 %v869_v17 }
  0xac   :  { %v370_v30 = vsel %vm362_vm3, %v353_v27, %v206_v21  ;;  %v369_v31 = vsel %vm362_vm3, %v352_v28, %v204_v22  ;;  %v2505_v21 = vld [vmem:[%s5001_s2 + $0x280] sm:$0xff] }
  0xad   :  { %3170 = vmatprep.subr.mxu0 %v2505_v21 }
  0xae   :  { %3171 = vmatpush3.msra.mxu0 %v2505_v21 }
  0xaf   :  { %v256_v23 = vpop.permute.xlu1 %255  ;;  %v254_v26 = vpop.permute.xlu0 %253  ;;  %2865 = vmatprep.subr.mxu0 %v853_v18 }
  0xb0   :  { %v387_v32 = vsel %vm379_vm4, %v370_v30, %v256_v23  ;;  %v386_v33 = vsel %vm379_vm4, %v369_v31, %v254_v26 }
  0xb3   :  { %v312_v34 = vpop.permute.xlu1 %311  ;;  %v310_v36 = vpop.permute.xlu0 %309 }
  0xb4   :  { %v404_v37 = vsel %vm396_vm5, %v387_v32, %v312_v34  ;;  %v403_v38 = vsel %vm396_vm5, %v386_v33, %v310_v36 }
  0xb5   :  { %3125 = vmatprep.mubr.msk.f32.mxu0 %vm425_vm6, %v403_v38 }
  0xb6   :  { %3126 = vmatmul.mubr.msk.f32.gmra.mxu0 %vm425_vm6, %v404_v37 }
  0xb7   :  { %v162_v40 = vpop.permute.xlu1 %161  ;;  %v160_v41 = vpop.permute.xlu0 %159 }
  0xb8   :  { %v354_v46 = vsel %vm345_vm2, %v3566_v51, %v160_v41  ;;  %v355_v54 = vsel %vm345_vm2, %v3558_v49, %v162_v40 }
  0xbb   :  { %v210_v42 = vpop.permute.xlu1 %209  ;;  %v208_v43 = vpop.permute.xlu0 %207 }
  0xbc   :  { %v371_v47 = vsel %vm362_vm3, %v354_v46, %v208_v43  ;;  %v372_v56 = vsel %vm362_vm3, %v355_v54, %v210_v42 }
  0xbf   :  { %v260_v44 = vpop.permute.xlu1 %259  ;;  %v258_v45 = vpop.permute.xlu0 %257 }
  0xc0   :  { %v388_v48 = vsel %vm379_vm4, %v371_v47, %v258_v45  ;;  %v389_v59 = vsel %vm379_vm4, %v372_v56, %v260_v44 }
  0xc3   :  { %v164_v50 = vpop.permute.xlu1 %163  ;;  %v314_v52 = vpop.permute.xlu0 %313 }
  0xc4   :  { %v405_v53 = vsel %vm396_vm5, %v388_v48, %v314_v52  ;;  %v356_v26 = vsel %vm345_vm2, %v3586_v60, %v164_v50 }
  0xc5   :  { %3128 = vmatprep.mubr.msk.f32.mxu0 %vm425_vm6, %v405_v53 }
  0xc7   :  { %v166_v61 = vpop.permute.xlu1 %165  ;;  %v316_v62 = vpop.permute.xlu0 %315 }
  0xc8   :  { %v406_v3 = vsel %vm396_vm5, %v389_v59, %v316_v62  ;;  %v357_v33 = vsel %vm345_vm2, %v3597_v1, %v166_v61 }
  0xc9   :  { %3129 = vmatmul.mubr.msk.f32.gmra.mxu0 %vm425_vm6, %v406_v3 }
  0xcb   :  { %v214_v11 = vpop.permute.xlu1 %213  ;;  %v212_v12 = vpop.permute.xlu0 %211 }
  0xcc   :  { %v373_v27 = vsel %vm362_vm3, %v356_v26, %v212_v12  ;;  %v374_v34 = vsel %vm362_vm3, %v357_v33, %v214_v11  ;;  %v835_v26 = vld [vmem:[%s5001_s2 + $0x68] sm:$0xff] }
  0xcf   :  { %v264_v22 = vpop.permute.xlu1 %263  ;;  %v262_v23 = vpop.permute.xlu0 %261 }
  0xd0   :  { %v390_v28 = vsel %vm379_vm4, %v373_v27, %v262_v23  ;;  %v391_v36 = vsel %vm379_vm4, %v374_v34, %v264_v22  ;;  %v851_v22 = vld [vmem:[%s5001_s2 + $0xe8] sm:$0xff]  ;;  %v850_v27 = vld [vmem:[%s5001_s2 + $0xe0] sm:$0xff]  ;;  %v865_v34 = vld [vmem:[%s5001_s2 + $0x158] sm:$0xff] }
  0xd1   :  { %v867_v23 = vld [vmem:[%s5001_s2 + $0x168] sm:$0xff] }
  0xd3   :  { %v168_v30 = vpop.permute.xlu1 %167  ;;  %v318_v31 = vpop.permute.xlu0 %317 }
  0xd4   :  { %v407_v32 = vsel %vm396_vm5, %v390_v28, %v318_v31  ;;  %v358_v45 = vsel %vm345_vm2, %v3616_v8, %v168_v30  ;;  %v866_v28 = vld [vmem:[%s5001_s2 + $0x160] sm:$0xff] }
  0xd5   :  { %3131 = vmatprep.mubr.msk.f32.mxu0 %vm425_vm6, %v407_v32  ;;  %v834_v30 = vld [vmem:[%s5001_s2 + $0x60] sm:$0xff]  ;;  %v849_v32 = vld [vmem:[%s5001_s2 + $0xd8] sm:$0xff] }
  0xd7   :  { %v170_v37 = vpop.permute.xlu1 %169  ;;  %v320_v38 = vpop.permute.xlu0 %319 }
  0xd8   :  { %v408_v40 = vsel %vm396_vm5, %v391_v36, %v320_v38  ;;  %v359_v53 = vsel %vm345_vm2, %v3627_v13, %v170_v37  ;;  %v837_v13 = vld [vmem:[%s5001_s2 + $0x78] sm:$0xff]  ;;  %v848_v38 = vld [vmem:[%s5001_s2 + $0xd0] sm:$0xff] }
  0xd9   :  { %3132 = vmatmul.mubr.msk.f32.gmra.mxu0 %vm425_vm6, %v408_v40  ;;  %v833_v36 = vld [vmem:[%s5001_s2 + $0x58] sm:$0xff] }
  0xdb   :  { %v218_v41 = vpop.permute.xlu1 %217  ;;  %v216_v42 = vpop.permute.xlu0 %215 }
  0xdc   :  { %v375_v46 = vsel %vm362_vm3, %v358_v45, %v216_v42  ;;  %v376_v54 = vsel %vm362_vm3, %v359_v53, %v218_v41  ;;  %v864_v42 = vld [vmem:[%s5001_s2 + $0x150] sm:$0xff] }
  0xdf   :  { %v268_v43 = vpop.permute.xlu1 %267  ;;  %v266_v44 = vpop.permute.xlu0 %265 }
  0xe0   :  { %v392_v47 = vsel %vm379_vm4, %v375_v46, %v266_v44  ;;  %v393_v55 = vsel %vm379_vm4, %v376_v54, %v268_v43  ;;  %v832_v43 = vld [vmem:[%s5001_s2 + $0x50] sm:$0xff]  ;;  %v847_v44 = vld [vmem:[%s5001_s2 + $0xc8] sm:$0xff] }
  0xe1   :  { %v863_v46 = vld [vmem:[%s5001_s2 + $0x148] sm:$0xff] }
  0xe3   :  { %v172_v48 = vpop.permute.xlu1 %171  ;;  %v322_v50 = vpop.permute.xlu0 %321 }
  0xe4   :  { %v409_v52 = vsel %vm396_vm5, %v392_v47, %v322_v50  ;;  %v360_v3 = vsel %vm345_vm2, %v3646_v20, %v172_v48  ;;  %v868_v20 = vld [vmem:[%s5001_s2 + $0x170] sm:$0xff]  ;;  %v831_v48 = vld [vmem:[%s5001_s2 + $0x48] sm:$0xff] }
  0xe5   :  { %3134 = vmatprep.mubr.msk.f32.mxu0 %vm425_vm6, %v409_v52 }
  0xe7   :  { %v174_v56 = vpop.permute.xlu1 %173  ;;  %v324_v57 = vpop.permute.xlu0 %323 }
  0xe8   :  { %v410_v58 = vsel %vm396_vm5, %v393_v55, %v324_v57  ;;  %v361_v4 = vsel %vm345_vm2, %v3657_v25, %v174_v56  ;;  %v852_v25 = vld [vmem:[%s5001_s2 + $0xf0] sm:$0xff]  ;;  %v862_v55 = vld [vmem:[%s5001_s2 + $0x140] sm:$0xff] }
  0xe9   :  { %3135 = vmatmul.mubr.msk.f32.gmra.mxu0 %vm425_vm6, %v410_v58  ;;  %v846_v56 = vld [vmem:[%s5001_s2 + $0xc0] sm:$0xff]  ;;  %v861_v58 = vld [vmem:[%s5001_s2 + $0x138] sm:$0xff] }
  0xea   :  { %v830_v57 = vld [vmem:[%s5001_s2 + $0x40] sm:$0xff] }
  0xeb   :  { %v222_v59 = vpop.permute.xlu1 %221  ;;  %v220_v61 = vpop.permute.xlu0 %219 }
  0xec   :  { %v378_v5 = vsel %vm362_vm3, %v361_v4, %v222_v59  ;;  %v377_v6 = vsel %vm362_vm3, %v360_v3, %v220_v61  ;;  %v845_v61 = vld [vmem:[%s5001_s2 + $0xb8] sm:$0xff]  ;;  %v844_v3 = vld [vmem:[%s5001_s2 + $0xb0] sm:$0xff] }
  0xed   :  { %v828_v4 = vld [vmem:[%s5001_s2 + $0x30] sm:$0xff] }
  0xef   :  { %v272_v62 = vpop.permute.xlu1 %271  ;;  %v270_v63 = vpop.permute.xlu0 %269 }
  0xf0   :  { %v395_v7 = vsel %vm379_vm4, %v378_v5, %v272_v62  ;;  %v394_v9 = vsel %vm379_vm4, %v377_v6, %v270_v63  ;;  %v829_v62 = vld [vmem:[%s5001_s2 + $0x38] sm:$0xff]  ;;  %v860_v63 = vld [vmem:[%s5001_s2 + $0x130] sm:$0xff]  ;;  %v859_v5 = vld [vmem:[%s5001_s2 + $0x128] sm:$0xff] }
  0xf3   :  { %v328_v11 = vpop.permute.xlu1 %327  ;;  %v326_v12 = vpop.permute.xlu0 %325 }
  0xf4   :  { %v412_v15 = vsel %vm396_vm5, %v395_v7, %v328_v11  ;;  %v411_v16 = vsel %vm396_vm5, %v394_v9, %v326_v12  ;;  %v843_v7 = vld [vmem:[%s5001_s2 + $0xa8] sm:$0xff]  ;;  %v858_v12 = vld [vmem:[%s5001_s2 + $0x120] sm:$0xff] }
  0xf5   :  { %3137 = vmatprep.mubr.msk.f32.mxu0 %vm425_vm6, %v411_v16  ;;  %v827_v11 = vld [vmem:[%s5001_s2 + $0x28] sm:$0xff]  ;;  %v842_v16 = vld [vmem:[%s5001_s2 + $0xa0] sm:$0xff] }
  0xf6   :  { %3138 = vmatmul.mubr.msk.f32.gmra.mxu0 %vm425_vm6, %v412_v15 }
 0x146   :  { %v3118_v2 = vpop.f32.mrf.mxu0 }
 0x147   :  { %v550_v10 = vadd.f32 %v3118_v2, %v3948_v0  ;;  %v826_v2 = vld [vmem:[%s5001_s2 + $0x20] sm:$0xff] }
 0x148   :  { %v544_v14 = vpop.f32.mrf.mxu0 }
 0x149   :  { %vm624_vm7 = vcmp.gt.f32.partialorder %v550_v10, 0.0  ;;  %v640_v24 = vmul.f32 0.2, %v550_v10  ;;  %v545_v29 = vadd.f32 %v3948_v0, %v544_v14  ;;  %v841_v14 = vld [vmem:[%s5001_s2 + $0x98] sm:$0xff] }
 0x14b   :  { %vm623_vm9 = vcmp.gt.f32.partialorder %v545_v29, 0.0  ;;  %v639_v35 = vmul.f32 0.2, %v545_v29  ;;  %v3956_v39 = vsel %vm624_vm7, %v550_v10, %v640_v24  ;;  %v857_v10 = vld [vmem:[%s5001_s2 + $0x118] sm:$0xff] }
 0x14c   :  { %v3968_v8 = vrot.slane %v3956_v39, 1  ;;  %v3993_v21 = vrot.slane %v3956_v39, 7 }
 0x14d   :  { %v3958_v49 = vsel %vm623_vm9, %v545_v29, %v639_v35  ;;  %v825_v29 = vld [vmem:[%s5001_s2 + $0x18] sm:$0xff] }
 0x14e   :  { %1111 = vmatprep.mubr.f32.mxu1 %v3958_v49  ;;  %v726_v60 = vrot.slane %v3958_v49, 7  ;;  %v775_v1 = vrot.slane %v3958_v49, 1 }
 0x150   :  { %2522 = vmatmul.mubr.msk.f32.vlgmr.msra.gmra.mxu1 %vm3960_vm10, %v726_v60  ;;  %3172 = vmatprep.mubr.msk.f32.mxu0 %vm94_vm0, %v775_v1 }
 0x151   :  { %1116 = vmatprep.mubr.f32.mxu1 %v3956_v39  ;;  %3173 = vmatmul.mubr.msk.f32.vlgmr.msra.gmra.mxu0 %vm94_vm0, %v3968_v8 }
 0x152   :  { %3197 = vmatpush3.msra.mxu1 %v869_v17  ;;  %2866 = vmatpush3.msra.mxu0 %v837_v13  ;;  %v840_v13 = vld [vmem:[%s5001_s2 + $0x90] sm:$0xff] }
 0x153   :  { %3198 = vmatprep.subr.mxu1 %v868_v20  ;;  %2867 = vmatprep.subr.mxu0 %v852_v25 }
 0x154   :  { %2524 = vmatmul.mubr.msk.f32.gmra.mxu1 %vm3960_vm10, %v3993_v21  ;;  %2868 = vmatpush3.msra.mxu0 %v836_v19 }
 0x155   :  { %3199 = vmatpush3.msra.mxu1 %v868_v20  ;;  %2869 = vmatprep.subr.mxu0 %v851_v22  ;;  %v856_v20 = vld [vmem:[%s5001_s2 + $0x110] sm:$0xff] }
 0x156   :  { %v3121_v31 = vpop.f32.mrf.mxu0  ;;  %3200 = vmatprep.subr.mxu1 %v867_v23  ;;  %2870 = vmatpush3.msra.mxu0 %v835_v26  ;;  %v824_v26 = vld [vmem:[%s5001_s2 + $0x10] sm:$0xff] }
 0x157   :  { %v560_v33 = vadd.f32 %v3121_v31, %v3948_v0  ;;  %3201 = vmatpush3.msra.mxu1 %v867_v23  ;;  %2871 = vmatprep.subr.mxu0 %v850_v27  ;;  %v839_v27 = vld [vmem:[%s5001_s2 + $0x88] sm:$0xff] }
 0x158   :  { %v554_v37 = vpop.f32.mrf.mxu0  ;;  %3202 = vmatprep.subr.mxu1 %v866_v28  ;;  %2872 = vmatpush3.msra.mxu0 %v834_v30  ;;  %v823_v30 = vld [vmem:[%s5001_s2 + $0x8] sm:$0xff] }
 0x159   :  { %vm626_vm11 = vcmp.gt.f32.partialorder %v560_v33, 0.0  ;;  %v642_v40 = vmul.f32 0.2, %v560_v33  ;;  %v555_v41 = vadd.f32 %v3948_v0, %v554_v37  ;;  %3203 = vmatpush3.msra.mxu1 %v866_v28  ;;  %2873 = vmatprep.subr.mxu0 %v849_v32  ;;  %v855_v28 = vld [vmem:[%s5001_s2 + $0x108] sm:$0xff]  ;;  %v838_v32 = vld [vmem:[%s5001_s2 + $0x80] sm:$0xff]  ;;  %v2648_v37 = vld [vmem:[%s5001_s2 + $0x3f8] sm:$0xff] }
 0x15a   :  { %3204 = vmatprep.subr.mxu1 %v865_v34  ;;  %2874 = vmatpush3.msra.mxu0 %v833_v36  ;;  %v4187_v36 = vld [vmem:[%s5001_s2 + $0x478] sm:$0xff] }
 0x15b   :  { %vm625_vm12 = vcmp.gt.f32.partialorder %v555_v41, 0.0  ;;  %v641_v45 = vmul.f32 0.2, %v555_v41  ;;  %3205 = vmatpush3.msra.mxu1 %v865_v34  ;;  %2875 = vmatprep.subr.mxu0 %v848_v38  ;;  %v4042_v47 = vsel %vm626_vm11, %v560_v33, %v642_v40  ;;  %v822_v33 = vld [vmem:[%s5001_s2] sm:$0xff] }
 0x15c   :  { %3206 = vmatprep.subr.mxu1 %v864_v42  ;;  %2876 = vmatpush3.msra.mxu0 %v832_v43  ;;  %v4057_v54 = vrot.slane %v4042_v47, 1  ;;  %v4080_v59 = vrot.slane %v4042_v47, 7  ;;  %v854_v34 = vld [vmem:[%s5001_s2 + $0x100] sm:$0xff] }
 0x15d   :  { %v4047_v50 = vsel %vm625_vm12, %v555_v41, %v641_v45  ;;  %3207 = vmatpush3.msra.mxu1 %v864_v42  ;;  %2877 = vmatprep.subr.mxu0 %v847_v44 }
 0x15e   :  { %1121 = vmatprep.mubr.f32.mxu1 %v4047_v50  ;;  %v4051_v52 = vrot.slane %v4047_v50, 7  ;;  %v4054_v53 = vrot.slane %v4047_v50, 1  ;;  %3208 = vmatprep.subr.mxu1 %v863_v46 }
 0x15f   :  { %3209 = vmatpush3.msra.mxu1 %v863_v46  ;;  %2878 = vmatpush3.msra.mxu0 %v831_v48 }
 0x160   :  { %2526 = vmatmul.mubr.msk.f32.gmra.mxu1 %vm3960_vm10, %v4051_v52  ;;  %3175 = vmatprep.mubr.msk.f32.mxu0 %vm94_vm0, %v4054_v53 }
 0x161   :  { %1126 = vmatprep.mubr.f32.mxu1 %v4042_v47  ;;  %3176 = vmatmul.mubr.msk.f32.gmra.mxu0 %vm94_vm0, %v4057_v54 }
 0x162   :  { %3210 = vmatprep.subr.mxu1 %v862_v55  ;;  %2879 = vmatprep.subr.mxu0 %v846_v56 }
 0x163   :  { %3211 = vmatpush3.msra.mxu1 %v862_v55  ;;  %2880 = vmatpush3.msra.mxu0 %v830_v57 }
 0x164   :  { %2528 = vmatmul.mubr.msk.f32.gmra.mxu1 %vm3960_vm10, %v4080_v59  ;;  %3212 = vmatprep.subr.mxu1 %v861_v58 }
 0x165   :  { %2881 = vmatprep.subr.mxu0 %v845_v61  ;;  %3213 = vmatpush3.msra.mxu1 %v861_v58 }
 0x166   :  { %v3124_v6 = vpop.f32.mrf.mxu0  ;;  %2882 = vmatpush3.msra.mxu0 %v829_v62  ;;  %3214 = vmatprep.subr.mxu1 %v860_v63 }
 0x167   :  { %v570_v9 = vadd.f32 %v3124_v6, %v3948_v0  ;;  %2883 = vmatprep.subr.mxu0 %v844_v3  ;;  %3215 = vmatpush3.msra.mxu1 %v860_v63 }
 0x168   :  { %v564_v15 = vpop.f32.mrf.mxu0  ;;  %2884 = vmatpush3.msra.mxu0 %v828_v4  ;;  %3216 = vmatprep.subr.mxu1 %v859_v5 }
 0x169   :  { %vm628_vm13 = vcmp.gt.f32.partialorder %v570_v9, 0.0  ;;  %v644_v17 = vmul.f32 0.2, %v570_v9  ;;  %v565_v18 = vadd.f32 %v3948_v0, %v564_v15  ;;  %2885 = vmatprep.subr.mxu0 %v843_v7  ;;  %3217 = vmatpush3.msra.mxu1 %v859_v5 }
 0x16a   :  { %2886 = vmatpush3.msra.mxu0 %v827_v11  ;;  %3218 = vmatprep.subr.mxu1 %v858_v12 }
 0x16b   :  { %vm627_vm14 = vcmp.gt.f32.partialorder %v565_v18, 0.0  ;;  %v643_v24 = vmul.f32 0.2, %v565_v18  ;;  %2887 = vmatprep.subr.mxu0 %v842_v16  ;;  %3219 = vmatpush3.msra.mxu1 %v858_v12  ;;  %v4129_v35 = vsel %vm628_vm13, %v570_v9, %v644_v17 }
 0x16c   :  { %2888 = vmatpush3.msra.mxu0 %v826_v2  ;;  %3220 = vmatprep.subr.mxu1 %v857_v10  ;;  %v4147_v23 = vrot.slane %v4129_v35, 1  ;;  %v4170_v31 = vrot.slane %v4129_v35, 7 }
 0x16d   :  { %v4137_v25 = vsel %vm627_vm14, %v565_v18, %v643_v24  ;;  %2889 = vmatprep.subr.mxu0 %v841_v14  ;;  %3221 = vmatpush3.msra.mxu1 %v857_v10 }
 0x16e   :  { %1131 = vmatprep.mubr.f32.mxu1 %v4137_v25  ;;  %v4141_v19 = vrot.slane %v4137_v25, 7  ;;  %v4144_v22 = vrot.slane %v4137_v25, 1  ;;  %2890 = vmatpush3.msra.mxu0 %v825_v29 }
 0x16f   :  { %2891 = vmatprep.subr.mxu0 %v840_v13  ;;  %3222 = vmatprep.subr.mxu1 %v856_v20 }
 0x170   :  { %2530 = vmatmul.mubr.msk.f32.gmra.mxu1 %vm3960_vm10, %v4141_v19  ;;  %3178 = vmatprep.mubr.msk.f32.mxu0 %vm94_vm0, %v4144_v22 }
 0x171   :  { %1136 = vmatprep.mubr.f32.mxu1 %v4129_v35  ;;  %3179 = vmatmul.mubr.msk.f32.gmra.mxu0 %vm94_vm0, %v4147_v23 }
 0x172   :  { %2892 = vmatpush3.msra.mxu0 %v824_v26  ;;  %3223 = vmatpush3.msra.mxu1 %v856_v20 }
 0x173   :  { %2893 = vmatprep.subr.mxu0 %v839_v27  ;;  %3224 = vmatprep.subr.mxu1 %v855_v28 }
 0x174   :  { %2532 = vmatmul.mubr.msk.f32.gmra.mxu1 %vm3960_vm10, %v4170_v31  ;;  %2894 = vmatpush3.msra.mxu0 %v823_v30 }
 0x175   :  { %2895 = vmatprep.subr.mxu0 %v838_v32  ;;  %3225 = vmatpush3.msra.mxu1 %v855_v28 }
 0x176   :  { %v3127_v38 = vpop.f32.mrf.mxu0  ;;  %2896 = vmatpush3.msra.mxu0 %v822_v33  ;;  %3226 = vmatprep.subr.mxu1 %v854_v34 }
 0x177   :  { %v580_v40 = vadd.f32 %v3127_v38, %v3948_v0  ;;  %3252 = vmatprep.subr.mxu0 %v4187_v36  ;;  %3227 = vmatpush3.msra.mxu1 %v854_v34 }
 0x178   :  { %v574_v41 = vpop.f32.mrf.mxu0  ;;  %2977 = vmatprep.subr.mxu1 %v2648_v37 }
 0x179   :  { %vm630_vm15 = vcmp.gt.f32.partialorder %v580_v40, 0.0  ;;  %v646_v42 = vmul.f32 0.2, %v580_v40  ;;  %v575_v43 = vadd.f32 %v3948_v0, %v574_v41 }
 0x17b   :  { %vm629_vm2 = vcmp.gt.f32.partialorder %v575_v43, 0.0  ;;  %v645_v44 = vmul.f32 0.2, %v575_v43  ;;  %v4195_v45 = vsel %vm630_vm15, %v580_v40, %v646_v42 }
 0x17c   :  { %v957_v56 = vrot.slane %v4195_v45, 1  ;;  %v909_v57 = vrot.slane %v4195_v45, 7 }
 0x17d   :  { %v4197_v46 = vsel %vm629_vm2, %v575_v43, %v645_v44 }
 0x17e   :  { %1141 = vmatprep.mubr.f32.mxu1 %v4197_v46  ;;  %v4201_v48 = vrot.slane %v4197_v46, 7  ;;  %v4204_v55 = vrot.slane %v4197_v46, 1 }
 0x180   :  { %2534 = vmatmul.mubr.msk.f32.gmra.mxu1 %vm3960_vm10, %v4201_v48  ;;  %3181 = vmatprep.mubr.msk.f32.mxu0 %vm94_vm0, %v4204_v55 }
 0x181   :  { %1146 = vmatprep.mubr.f32.mxu1 %v4195_v45  ;;  %3182 = vmatmul.mubr.msk.f32.gmra.mxu0 %vm94_vm0, %v957_v56 }
 0x184   :  { %2536 = vmatmul.mubr.msk.f32.gmra.mxu1 %vm3960_vm10, %v909_v57 }
 0x189   :  { %v3130_v58 = vpop.f32.mrf.mxu0 }
 0x18a   :  { %v590_v61 = vadd.f32 %v3130_v58, %v3948_v0 }
 0x18b   :  { %v584_v62 = vpop.f32.mrf.mxu0 }
 0x18c   :  { %vm632_vm3 = vcmp.gt.f32.partialorder %v590_v61, 0.0  ;;  %v648_v63 = vmul.f32 0.2, %v590_v61  ;;  %v585_v3 = vadd.f32 %v3948_v0, %v584_v62 }
 0x18e   :  { %vm631_vm4 = vcmp.gt.f32.partialorder %v585_v3, 0.0  ;;  %v647_v4 = vmul.f32 0.2, %v585_v3  ;;  %v4223_v5 = vsel %vm632_vm3, %v590_v61, %v648_v63 }
 0x18f   :  { %v4231_v11 = vrot.slane %v4223_v5, 1  ;;  %v4244_v12 = vrot.slane %v4223_v5, 7 }
 0x190   :  { %v4225_v6 = vsel %vm631_vm4, %v585_v3, %v647_v4 }
 0x191   :  { %1151 = vmatprep.mubr.f32.mxu1 %v4225_v6  ;;  %v734_v7 = vrot.slane %v4225_v6, 7  ;;  %v783_v9 = vrot.slane %v4225_v6, 1 }
 0x193   :  { %2538 = vmatmul.mubr.msk.f32.gmra.mxu1 %vm3960_vm10, %v734_v7  ;;  %3184 = vmatprep.mubr.msk.f32.mxu0 %vm94_vm0, %v783_v9 }
 0x194   :  { %1156 = vmatprep.mubr.f32.mxu1 %v4223_v5  ;;  %3185 = vmatmul.mubr.msk.f32.gmra.mxu0 %vm94_vm0, %v4231_v11 }
 0x197   :  { %2540 = vmatmul.mubr.msk.f32.gmra.mxu1 %vm3960_vm10, %v4244_v12 }
 0x199   :  { %v3133_v15 = vpop.f32.mrf.mxu0 }
 0x19a   :  { %v600_v16 = vadd.f32 %v3133_v15, %v3948_v0 }
 0x19b   :  { %v594_v17 = vpop.f32.mrf.mxu0 }
 0x19c   :  { %vm634_vm5 = vcmp.gt.f32.partialorder %v600_v16, 0.0  ;;  %v650_v18 = vmul.f32 0.2, %v600_v16  ;;  %v595_v2 = vadd.f32 %v3948_v0, %v594_v17 }
 0x19e   :  { %vm633_vm6 = vcmp.gt.f32.partialorder %v595_v2, 0.0  ;;  %v649_v10 = vmul.f32 0.2, %v595_v2  ;;  %v4251_v14 = vsel %vm634_vm5, %v600_v16, %v650_v18 }
 0x19f   :  { %v4263_v20 = vrot.slane %v4251_v14, 1  ;;  %v4274_v26 = vrot.slane %v4251_v14, 7 }
 0x1a0   :  { %v4253_v24 = vsel %vm633_vm6, %v595_v2, %v649_v10 }
 0x1a1   :  { %1161 = vmatprep.mubr.f32.mxu1 %v4253_v24  ;;  %v4257_v29 = vrot.slane %v4253_v24, 7  ;;  %v4260_v13 = vrot.slane %v4253_v24, 1 }
 0x1a3   :  { %2542 = vmatmul.mubr.msk.f32.gmra.mxu1 %vm3960_vm10, %v4257_v29  ;;  %3187 = vmatprep.mubr.msk.f32.mxu0 %vm94_vm0, %v4260_v13 }
 0x1a4   :  { %1166 = vmatprep.mubr.f32.mxu1 %v4251_v14  ;;  %3188 = vmatmul.mubr.msk.f32.gmra.mxu0 %vm94_vm0, %v4263_v20 }
 0x1a7   :  { %2544 = vmatmul.mubr.msk.f32.gmra.mxu1 %vm3960_vm10, %v4274_v26 }
 0x1a9   :  { %v3136_v27 = vpop.f32.mrf.mxu0 }
 0x1aa   :  { %v610_v28 = vadd.f32 %v3136_v27, %v3948_v0 }
 0x1ab   :  { %v604_v30 = vpop.f32.mrf.mxu0 }
 0x1ac   :  { %vm636_vm7 = vcmp.gt.f32.partialorder %v610_v28, 0.0  ;;  %v652_v32 = vmul.f32 0.2, %v610_v28  ;;  %v605_v33 = vadd.f32 %v3948_v0, %v604_v30  ;;  %v2632_v30 = vld [vmem:[%s5001_s2 + $0x378] sm:$0xff] }
 0x1ae   :  { %vm635_vm8 = vcmp.gt.f32.partialorder %v605_v33, 0.0  ;;  %v651_v34 = vmul.f32 0.2, %v605_v33  ;;  %v4281_v37 = vsel %vm636_vm7, %v610_v28, %v652_v32  ;;  %v4347_v28 = vld [vmem:[%s5001_s2 + $0x470] sm:$0xff] }
 0x1af   :  { %v4293_v42 = vrot.slane %v4281_v37, 1  ;;  %v4304_v43 = vrot.slane %v4281_v37, 7  ;;  %v2647_v32 = vld [vmem:[%s5001_s2 + $0x3f0] sm:$0xff] }
 0x1b0   :  { %v4283_v38 = vsel %vm635_vm8, %v605_v33, %v651_v34  ;;  %v4370_v33 = vld [vmem:[%s5001_s2 + $0x468] sm:$0xff] }
 0x1b1   :  { %1171 = vmatprep.mubr.f32.mxu1 %v4283_v38  ;;  %v4287_v40 = vrot.slane %v4283_v38, 7  ;;  %v4290_v41 = vrot.slane %v4283_v38, 1  ;;  %v2646_v34 = vld [vmem:[%s5001_s2 + $0x3e8] sm:$0xff] }
 0x1b3   :  { %2546 = vmatmul.mubr.msk.f32.gmra.mxu1 %vm3960_vm10, %v4287_v40  ;;  %3190 = vmatprep.mubr.msk.f32.mxu0 %vm94_vm0, %v4290_v41 }
 0x1b4   :  { %1176 = vmatprep.mubr.f32.mxu1 %v4281_v37  ;;  %3191 = vmatmul.mubr.msk.f32.gmra.mxu0 %vm94_vm0, %v4293_v42 }
 0x1b6   :  { %v3139_v44 = vpop.f32.mrf.mxu0 }
 0x1b7   :  { %v620_v58 = vadd.f32 %v3139_v44, %v3948_v0  ;;  %2548 = vmatmul.mubr.msk.f32.gmra.mxu1 %vm3960_vm10, %v4304_v43  ;;  %v4398_v44 = vld [vmem:[%s5001_s2 + $0x460] sm:$0xff] }
 0x1b8   :  { %v614_v61 = vpop.f32.mrf.mxu0 }
 0x1b9   :  { %vm638_vm9 = vcmp.gt.f32.partialorder %v620_v58, 0.0  ;;  %v654_v62 = vmul.f32 0.2, %v620_v58  ;;  %v615_v63 = vadd.f32 %v3948_v0, %v614_v61  ;;  %v3377_v0 = vmov 0.0   ;;  %v2644_v61 = vld [vmem:[%s5001_s2 + $0x3d8] sm:$0xff] }
 0x1ba   :  { %v4333_v2 = vrot.slane %v3377_v0, 7  ;;  %v4336_v10 = vrot.slane %v3377_v0, 1 }
 0x1bb   :  { %vm637_vm11 = vcmp.gt.f32.partialorder %v615_v63, 0.0  ;;  %v653_v3 = vmul.f32 0.2, %v615_v63  ;;  %v4311_v4 = vsel %vm638_vm9, %v620_v58, %v654_v62  ;;  %v2629_v58 = vld [vmem:[%s5001_s2 + $0x360] sm:$0xff]  ;;  %v2628_v62 = vld [vmem:[%s5001_s2 + $0x358] sm:$0xff] }
 0x1bc   :  { %v965_v18 = vrot.slane %v4311_v4, 1  ;;  %v917_v27 = vrot.slane %v4311_v4, 7 }
 0x1bd   :  { %v4313_v15 = vsel %vm637_vm11, %v615_v63, %v653_v3  ;;  %v2643_v63 = vld [vmem:[%s5001_s2 + $0x3d0] sm:$0xff]  ;;  %v4425_v3 = vld [vmem:[%s5001_s2 + $0x458] sm:$0xff] }
 0x1be   :  { %1181 = vmatprep.mubr.f32.mxu1 %v4313_v15  ;;  %v4317_v16 = vrot.slane %v4313_v15, 7  ;;  %v4320_v17 = vrot.slane %v4313_v15, 1 }
 0x1c0   :  { %2550 = vmatmul.mubr.msk.f32.gmra.mxu1 %vm3960_vm10, %v4317_v16  ;;  %3193 = vmatprep.mubr.msk.f32.mxu0 %vm94_vm0, %v4320_v17 }
 0x1c1   :  { %1186 = vmatprep.mubr.f32.mxu1 %v4311_v4  ;;  %3194 = vmatmul.mubr.msk.f32.gmra.mxu0 %vm94_vm0, %v965_v18 }
 0x1c2   :  { %1401 = vmatprep.mubr.f32.mxu0 %v3377_v0 }
 0x1c4   :  { %2552 = vmatmul.mubr.msk.f32.gmra.mxu1 %vm3960_vm10, %v917_v27 }
 0x1c5   :  { %2570 = vmatmul.mubr.msk.f32.vlgmr.msra.gmra.mxu0 %vm3960_vm10, %v4333_v2  ;;  %3228 = vmatprep.mubr.msk.f32.mxu1 %vm94_vm0, %v4336_v10 }
 0x1c6   :  { %3253 = vmatpush3.msra.mxu0 %v4187_v36  ;;  %1406 = vmatprep.mubr.f32.mxu0 %v3958_v49  ;;  %v2630_v49 = vld [vmem:[%s5001_s2 + $0x368] sm:$0xff] }
 0x1c7   :  { %3254 = vmatprep.subr.mxu0 %v4347_v28 }
 0x1c8   :  { %3229 = vmatmul.mubr.msk.f32.vlgmr.msra.gmra.mxu1 %vm94_vm0, %v775_v1  ;;  %3255 = vmatpush3.msra.mxu0 %v4347_v28  ;;  %v2631_v1 = vld [vmem:[%s5001_s2 + $0x370] sm:$0xff] }
 0x1c9   :  { %2572 = vmatmul.mubr.msk.f32.gmra.mxu0 %vm3960_vm10, %v726_v60  ;;  %3231 = vmatprep.mubr.msk.f32.mxu1 %vm94_vm0, %v3968_v8  ;;  %v2645_v60 = vld [vmem:[%s5001_s2 + $0x3e0] sm:$0xff] }
 0x1ca   :  { %2978 = vmatpush3.msra.mxu1 %v2632_v30  ;;  %1411 = vmatprep.mubr.f32.mxu0 %v3956_v39  ;;  %v2627_v30 = vld [vmem:[%s5001_s2 + $0x350] sm:$0xff] }
 0x1cb   :  { %2979 = vmatprep.subr.mxu1 %v2647_v32  ;;  %3256 = vmatprep.subr.mxu0 %v4370_v33  ;;  %v2642_v32 = vld [vmem:[%s5001_s2 + $0x3c8] sm:$0xff] }
 0x1cc   :  { %2980 = vmatpush3.msra.mxu1 %v2631_v1  ;;  %3257 = vmatpush3.msra.mxu0 %v4370_v33  ;;  %v2626_v1 = vld [vmem:[%s5001_s2 + $0x348] sm:$0xff] }
 0x1cd   :  { %3232 = vmatmul.mubr.msk.f32.gmra.mxu1 %vm94_vm0, %v4054_v53  ;;  %2981 = vmatprep.subr.mxu1 %v2646_v34  ;;  %v2641_v34 = vld [vmem:[%s5001_s2 + $0x3c0] sm:$0xff] }
 0x1ce   :  { %2574 = vmatmul.mubr.msk.f32.gmra.mxu0 %vm3960_vm10, %v3993_v21  ;;  %3234 = vmatprep.mubr.msk.f32.mxu1 %vm94_vm0, %v4057_v54 }
 0x1cf   :  { %2982 = vmatpush3.msra.mxu1 %v2630_v49  ;;  %1416 = vmatprep.mubr.f32.mxu0 %v4047_v50  ;;  %v2625_v49 = vld [vmem:[%s5001_s2 + $0x340] sm:$0xff] }
 0x1d0   :  { %2983 = vmatprep.subr.mxu1 %v2645_v60  ;;  %3258 = vmatprep.subr.mxu0 %v4398_v44  ;;  %v2640_v60 = vld [vmem:[%s5001_s2 + $0x3b8] sm:$0xff] }
 0x1d1   :  { %2984 = vmatpush3.msra.mxu1 %v2629_v58  ;;  %3259 = vmatpush3.msra.mxu0 %v4398_v44  ;;  %v4462_v58 = vld [vmem:[%s5001_s2 + $0x450] sm:$0xff] }
 0x1d2   :  { %3235 = vmatmul.mubr.msk.f32.gmra.mxu1 %vm94_vm0, %v4144_v22  ;;  %2985 = vmatprep.subr.mxu1 %v2644_v61  ;;  %v2624_v61 = vld [vmem:[%s5001_s2 + $0x338] sm:$0xff] }
 0x1d3   :  { %2576 = vmatmul.mubr.msk.f32.gmra.mxu0 %vm3960_vm10, %v4051_v52  ;;  %3237 = vmatprep.mubr.msk.f32.mxu1 %vm94_vm0, %v4147_v23 }
 0x1d4   :  { %2986 = vmatpush3.msra.mxu1 %v2628_v62  ;;  %1421 = vmatprep.mubr.f32.mxu0 %v4042_v47  ;;  %v2639_v62 = vld [vmem:[%s5001_s2 + $0x3b0] sm:$0xff] }
 0x1d5   :  { %2987 = vmatprep.subr.mxu1 %v2643_v63  ;;  %3260 = vmatprep.subr.mxu0 %v4425_v3  ;;  %v2623_v63 = vld [vmem:[%s5001_s2 + $0x330] sm:$0xff] }
 0x1d6   :  { %2988 = vmatpush3.msra.mxu1 %v2627_v30  ;;  %3261 = vmatpush3.msra.mxu0 %v4425_v3  ;;  %v2638_v30 = vld [vmem:[%s5001_s2 + $0x3a8] sm:$0xff] }
 0x1d7   :  { %3238 = vmatmul.mubr.msk.f32.gmra.mxu1 %vm94_vm0, %v4204_v55  ;;  %2989 = vmatprep.subr.mxu1 %v2642_v32  ;;  %v2622_v32 = vld [vmem:[%s5001_s2 + $0x328] sm:$0xff] }
 0x1d8   :  { %2578 = vmatmul.mubr.msk.f32.gmra.mxu0 %vm3960_vm10, %v4080_v59  ;;  %2990 = vmatpush3.msra.mxu1 %v2626_v1  ;;  %v2637_v1 = vld [vmem:[%s5001_s2 + $0x3a0] sm:$0xff] }
 0x1d9   :  { %1426 = vmatprep.mubr.f32.mxu0 %v4137_v25  ;;  %2991 = vmatprep.subr.mxu1 %v2641_v34  ;;  %v2621_v34 = vld [vmem:[%s5001_s2 + $0x320] sm:$0xff] }
 0x1da   :  { %3240 = vmatprep.mubr.msk.f32.mxu1 %vm94_vm0, %v4336_v10  ;;  %2992 = vmatpush3.msra.mxu1 %v2625_v49  ;;  %v4514_v49 = vld [vmem:[%s5001_s2 + $0x440] sm:$0xff] }
 0x1db   :  { %3241 = vmatmul.mubr.msk.f32.gmra.mxu1 %vm94_vm0, %v783_v9  ;;  %2993 = vmatprep.subr.mxu1 %v2640_v60  ;;  %v4487_v9 = vld [vmem:[%s5001_s2 + $0x448] sm:$0xff]  ;;  %v2636_v60 = vld [vmem:[%s5001_s2 + $0x398] sm:$0xff] }
 0x1dc   :  { %3262 = vmatprep.subr.mxu0 %v4462_v58  ;;  %2580 = vmatmul.mubr.msk.f32.gmra.mxu0 %vm3960_vm10, %v4141_v19 }
 0x1dd   :  { %3243 = vmatprep.mubr.msk.f32.mxu1 %vm94_vm0, %v4231_v11  ;;  %2994 = vmatpush3.msra.mxu1 %v2624_v61  ;;  %v2620_v61 = vld [vmem:[%s5001_s2 + $0x318] sm:$0xff] }
 0x1de   :  { %3263 = vmatpush3.msra.mxu0 %v4462_v58  ;;  %1431 = vmatprep.mubr.f32.mxu0 %v4129_v35 }
 0x1df   :  { %2995 = vmatprep.subr.mxu1 %v2639_v62  ;;  %3244 = vmatmul.mubr.msk.f32.gmra.mxu1 %vm94_vm0, %v4260_v13  ;;  %v2635_v62 = vld [vmem:[%s5001_s2 + $0x390] sm:$0xff] }
 0x1e0   :  { %2996 = vmatpush3.msra.mxu1 %v2623_v63  ;;  %3264 = vmatprep.subr.mxu0 %v4487_v9  ;;  %v2619_v63 = vld [vmem:[%s5001_s2 + $0x310] sm:$0xff] }
 0x1e1   :  { %2997 = vmatprep.subr.mxu1 %v2638_v30  ;;  %2582 = vmatmul.mubr.msk.f32.gmra.mxu0 %vm3960_vm10, %v4170_v31  ;;  %v2634_v30 = vld [vmem:[%s5001_s2 + $0x388] sm:$0xff] }
 0x1e2   :  { %3246 = vmatprep.mubr.msk.f32.mxu1 %vm94_vm0, %v4263_v20  ;;  %2998 = vmatpush3.msra.mxu1 %v2622_v32  ;;  %v4545_v32 = vld [vmem:[%s5001_s2 + $0x438] sm:$0xff] }
 0x1e3   :  { %3265 = vmatpush3.msra.mxu0 %v4487_v9  ;;  %1436 = vmatprep.mubr.f32.mxu0 %v4197_v46 }
 0x1e4   :  { %2999 = vmatprep.subr.mxu1 %v2637_v1  ;;  %3247 = vmatmul.mubr.msk.f32.gmra.mxu1 %vm94_vm0, %v4290_v41  ;;  %v2618_v1 = vld [vmem:[%s5001_s2 + $0x308] sm:$0xff] }
 0x1e5   :  { %3000 = vmatpush3.msra.mxu1 %v2621_v34  ;;  %3266 = vmatprep.subr.mxu0 %v4514_v49  ;;  %v2633_v34 = vld [vmem:[%s5001_s2 + $0x380] sm:$0xff] }
 0x1e6   :  { %3001 = vmatprep.subr.mxu1 %v2636_v60  ;;  %2584 = vmatmul.mubr.msk.f32.gmra.mxu0 %vm3960_vm10, %v4201_v48  ;;  %v4563_v60 = vld [vmem:[%s5001_s2 + $0x430] sm:$0xff] }
 0x1e7   :  { %3249 = vmatprep.mubr.msk.f32.mxu1 %vm94_vm0, %v4293_v42  ;;  %3002 = vmatpush3.msra.mxu1 %v2620_v61  ;;  %v2617_v61 = vld [vmem:[%s5001_s2 + $0x300] sm:$0xff] }
 0x1e8   :  { %3267 = vmatpush3.msra.mxu0 %v4514_v49  ;;  %3003 = vmatprep.subr.mxu1 %v2635_v62 }
 0x1e9   :  { %3004 = vmatpush3.msra.mxu1 %v2619_v63  ;;  %1441 = vmatprep.mubr.f32.mxu0 %v3377_v0 }
 0x1ea   :  { %3250 = vmatmul.mubr.msk.f32.gmra.mxu1 %vm94_vm0, %v4320_v17  ;;  %3005 = vmatprep.subr.mxu1 %v2634_v30 }
 0x1eb   :  { %3268 = vmatprep.subr.mxu0 %v4545_v32  ;;  %2586 = vmatmul.mubr.msk.f32.gmra.mxu0 %vm3960_vm10, %v4333_v2 }
 0x1ec   :  { %3006 = vmatpush3.msra.mxu1 %v2618_v1  ;;  %1869 = vmatprep.mubr.f32.mxu1 %v3956_v39  ;;  %v4579_v39 = vld [vmem:[%s5001_s2 + $0x428] sm:$0xff] }
 0x1ed   :  { %3269 = vmatpush3.msra.mxu0 %v4545_v32  ;;  %1446 = vmatprep.mubr.f32.mxu0 %v4225_v6  ;;  %v4595_v6 = vld [vmem:[%s5001_s2 + $0x420] sm:$0xff] }
 0x1ee   :  { %3007 = vmatprep.subr.mxu1 %v2633_v34  ;;  %3270 = vmatprep.subr.mxu0 %v4563_v60 }
 0x1ef   :  { %3008 = vmatpush3.msra.mxu1 %v2617_v61  ;;  %2588 = vmatmul.mubr.msk.f32.gmra.mxu0 %vm3960_vm10, %v734_v7 }
 0x1f0   :  { %2666 = vmatmul.mubr.msk.f32.vlgmr.msra.gmra.mxu1 %vm3960_vm10, %v3993_v21  ;;  %3271 = vmatpush3.msra.mxu0 %v4563_v60  ;;  %v4612_v21 = vld [vmem:[%s5001_s2 + $0x418] sm:$0xff] }
 0x1f1   :  { %1874 = vmatprep.mubr.f32.mxu1 %v4047_v50  ;;  %1451 = vmatprep.mubr.f32.mxu0 %v4223_v5  ;;  %v4646_v50 = vld [vmem:[%s5001_s2 + $0x408] sm:$0xff] }
 0x1f2   :  { %3272 = vmatprep.subr.mxu0 %v4579_v39  ;;  %3334 = vmatprep.subr.mxu1 %v4187_v36 }
 0x1f3   :  { %2590 = vmatmul.mubr.msk.f32.gmra.mxu0 %vm3960_vm10, %v4244_v12  ;;  %3350 = vmatpush3.msra.mxu1 %v4187_v36  ;;  %v2186_v36 = vpop.permute.xlu1 %2185 }
 0x1f4   :  { %2668 = vmatmul.mubr.msk.f32.gmra.mxu1 %vm3960_vm10, %v4051_v52  ;;  %3273 = vmatpush3.msra.mxu0 %v4579_v39  ;;  %v4663_v52 = vld [vmem:[%s5001_s2 + $0x400] sm:$0xff] }
 0x1f5   :  { %1879 = vmatprep.mubr.f32.mxu1 %v4042_v47  ;;  %1456 = vmatprep.mubr.f32.mxu0 %v4253_v24  ;;  %v4629_v47 = vld [vmem:[%s5001_s2 + $0x410] sm:$0xff] }
 0x1f6   :  { %3274 = vmatprep.subr.mxu0 %v4595_v6  ;;  %3335 = vmatprep.subr.mxu1 %v4347_v28 }
 0x1f7   :  { %2592 = vmatmul.mubr.msk.f32.gmra.mxu0 %vm3960_vm10, %v4257_v29  ;;  %3351 = vmatpush3.msra.mxu1 %v4347_v28 }
 0x1f8   :  { %2670 = vmatmul.mubr.msk.f32.gmra.mxu1 %vm3960_vm10, %v4080_v59  ;;  %3275 = vmatpush3.msra.mxu0 %v4595_v6  ;;  %v2182_v59 = vld [vmem:[%s5003_s3] sm:$0xf] }
 0x1f9   :  { %1884 = vmatprep.mubr.f32.mxu1 %v4137_v25  ;;  %1461 = vmatprep.mubr.f32.mxu0 %v4251_v14 }
 0x1fa   :  { %3276 = vmatprep.subr.mxu0 %v4612_v21  ;;  %3336 = vmatprep.subr.mxu1 %v4370_v33 }
 0x1fb   :  { %2594 = vmatmul.mubr.msk.f32.gmra.mxu0 %vm3960_vm10, %v4274_v26  ;;  %3352 = vmatpush3.msra.mxu1 %v4370_v33 }
 0x1fc   :  { %2672 = vmatmul.mubr.msk.f32.gmra.mxu1 %vm3960_vm10, %v4141_v19  ;;  %3277 = vmatpush3.msra.mxu0 %v4612_v21  ;;  %v2184_v19 = vpop.permute.xlu0 %2183 }
 0x1fd   :  { %1889 = vmatprep.mubr.f32.mxu1 %v4129_v35  ;;  %1466 = vmatprep.mubr.f32.mxu0 %v4283_v38 }
 0x1fe   :  { %3278 = vmatprep.subr.mxu0 %v4629_v47  ;;  %3337 = vmatprep.subr.mxu1 %v4398_v44 }
 0x1ff   :  { %2596 = vmatmul.mubr.msk.f32.gmra.mxu0 %vm3960_vm10, %v4287_v40  ;;  %3353 = vmatpush3.msra.mxu1 %v4398_v44 }
 0x200   :  { %2674 = vmatmul.mubr.msk.f32.gmra.mxu1 %vm3960_vm10, %v4170_v31  ;;  %3279 = vmatpush3.msra.mxu0 %v4629_v47 }
 0x201   :  { %1894 = vmatprep.mubr.f32.mxu1 %v4197_v46  ;;  %1471 = vmatprep.mubr.f32.mxu0 %v4281_v37 }
 0x202   :  { %3280 = vmatprep.subr.mxu0 %v4646_v50  ;;  %3338 = vmatprep.subr.mxu1 %v4425_v3 }
 0x203   :  { %2598 = vmatmul.mubr.msk.f32.gmra.mxu0 %vm3960_vm10, %v4304_v43  ;;  %3354 = vmatpush3.msra.mxu1 %v4425_v3 }
 0x204   :  { %2676 = vmatmul.mubr.msk.f32.gmra.mxu1 %vm3960_vm10, %v4201_v48  ;;  %3281 = vmatpush3.msra.mxu0 %v4646_v50  ;;  %v2188_v48 = vpop.permute.xlu0 %2187 }
 0x205   :  { %1899 = vmatprep.mubr.f32.mxu1 %v4195_v45  ;;  %1476 = vmatprep.mubr.f32.mxu0 %v4313_v15 }
 0x206   :  { %3282 = vmatprep.subr.mxu0 %v4663_v52  ;;  %3339 = vmatprep.subr.mxu1 %v4462_v58 }
 0x207   :  { %2600 = vmatmul.mubr.msk.f32.gmra.mxu0 %vm3960_vm10, %v4317_v16  ;;  %3355 = vmatpush3.msra.mxu1 %v4462_v58 }
 0x208   :  { %2678 = vmatmul.mubr.msk.f32.gmra.mxu1 %vm3960_vm10, %v909_v57  ;;  %3283 = vmatpush3.msra.mxu0 %v4663_v52 }
 0x209   :  { %3284 = vmatprep.mubr.msk.f32.mxu0 %vm94_vm0, %v3968_v8  ;;  %1904 = vmatprep.mubr.f32.mxu1 %v3377_v0 }
 0x20a   :  { %3308 = vmatprep.subr.msk.mxu0 %vm474_vm1, %v2182_v59  ;;  %3340 = vmatprep.subr.mxu1 %v4487_v9 }
 0x20b   :  { %3285 = vmatmul.mubr.msk.f32.vlgmr.msra.gmra.mxu0 %vm94_vm0, %v4054_v53  ;;  %3356 = vmatpush3.msra.mxu1 %v4487_v9 }
 0x20c   :  { %2680 = vmatmul.mubr.msk.f32.gmra.mxu1 %vm3960_vm10, %v4333_v2  ;;  %3309 = vmatpush3.msk.msra.mxu0 %vm474_vm1, %v2182_v59  ;;  %vm2215_vm1 = vcmask 31744  }
 0x20d   :  { %1909 = vmatprep.mubr.f32.mxu1 %v4223_v5  ;;  %3287 = vmatprep.mubr.msk.f32.mxu0 %vm94_vm0, %v4057_v54 }
 0x20e   :  { %3341 = vmatprep.subr.mxu1 %v4514_v49 }
 0x20f   :  { %3288 = vmatmul.mubr.msk.f32.gmra.mxu0 %vm94_vm0, %v4144_v22  ;;  %3357 = vmatpush3.msra.mxu1 %v4514_v49 }
 0x210   :  { %2682 = vmatmul.mubr.msk.f32.gmra.mxu1 %vm3960_vm10, %v4244_v12  ;;  %3290 = vmatprep.mubr.msk.f32.mxu0 %vm94_vm0, %v4147_v23  ;;  %v2785_v8 = vpop.f32.mrf.mxu1 }
 0x211   :  { %1914 = vmatprep.mubr.f32.mxu1 %v4253_v24  ;;  %v3174_v53 = vpop.f32.mrf.mxu0  ;;  %3342 = vmatprep.subr.mxu1 %v4545_v32 }
 0x212   :  { %v2786_v54 = vpop.f32.mrf.mxu1  ;;  %3358 = vmatpush3.msra.mxu1 %v4545_v32 }
 0x213   :  { %3291 = vmatmul.mubr.msk.f32.gmra.mxu0 %vm94_vm0, %v4204_v55  ;;  %v2787_v35 = vadd.f32 %v2786_v54, %v2785_v8  ;;  %v1258_v25 = vpop.f32.mrf.mxu0  ;;  %3343 = vmatprep.subr.mxu1 %v4563_v60  ;;  %v2190_v55 = vpop.permute.xlu1 %2189 }
 0x214   :  { %2684 = vmatmul.mubr.msk.f32.gmra.mxu1 %vm3960_vm10, %v4257_v29  ;;  %3293 = vmatprep.mubr.msk.f32.mxu0 %vm94_vm0, %v957_v56  ;;  %v2788_v22 = vpop.f32.mrf.mxu1  ;;  %v2192_v56 = vpop.permute.xlu0 %2191 }
 0x215   :  { %1919 = vmatprep.mubr.f32.mxu1 %v4251_v14  ;;  %v4723_v23 = vadd.f32 %v2787_v35, %v1258_v25  ;;  %3359 = vmatpush3.msra.mxu1 %v4563_v60 }
 0x216   :  { %v2789_v31 = vpop.f32.mrf.mxu1  ;;  %3344 = vmatprep.subr.mxu1 %v4579_v39 }
 0x217   :  { %3294 = vmatmul.mubr.msk.f32.gmra.mxu0 %vm94_vm0, %v4336_v10  ;;  %v2790_v46 = vadd.f32 %v2789_v31, %v2788_v22  ;;  %3360 = vmatpush3.msra.mxu1 %v4579_v39 }
 0x218   :  { %2686 = vmatmul.mubr.msk.f32.gmra.mxu1 %vm3960_vm10, %v4274_v26  ;;  %3296 = vmatprep.mubr.msk.f32.mxu0 %vm94_vm0, %v4231_v11  ;;  %v2194_v11 = vpop.permute.xlu1 %2193 }
 0x219   :  { %1924 = vmatprep.mubr.f32.mxu1 %v4283_v38  ;;  %v4736_v45 = vadd.f32 %v3174_v53, %v2790_v46  ;;  %3345 = vmatprep.subr.mxu1 %v4595_v6 }
 0x21a   :  { %3361 = vmatpush3.msra.mxu1 %v4595_v6 }
 0x21b   :  { %3297 = vmatmul.mubr.msk.f32.gmra.mxu0 %vm94_vm0, %v4260_v13  ;;  %3346 = vmatprep.subr.mxu1 %v4612_v21  ;;  %v2196_v13 = vpop.permute.xlu0 %2195 }
 0x21c   :  { %2688 = vmatmul.mubr.msk.f32.gmra.mxu1 %vm3960_vm10, %v4287_v40  ;;  %3299 = vmatprep.mubr.msk.f32.mxu0 %vm94_vm0, %v4263_v20 }
 0x21d   :  { %1929 = vmatprep.mubr.f32.mxu1 %v4281_v37  ;;  %3362 = vmatpush3.msra.mxu1 %v4612_v21  ;;  %v2198_v37 = vpop.permute.xlu1 %2197 }
 0x21e   :  { %3347 = vmatprep.subr.mxu1 %v4629_v47 }
 0x21f   :  { %3300 = vmatmul.mubr.msk.f32.gmra.mxu0 %vm94_vm0, %v4290_v41  ;;  %3363 = vmatpush3.msra.mxu1 %v4629_v47  ;;  %v2200_v40 = vpop.permute.xlu0 %2199 }
 0x220   :  { %2690 = vmatmul.mubr.msk.f32.gmra.mxu1 %vm3960_vm10, %v4304_v43  ;;  %3302 = vmatprep.mubr.msk.f32.mxu0 %vm94_vm0, %v4293_v42  ;;  %v2791_v57 = vpop.f32.mrf.mxu1 }
 0x221   :  { %1934 = vmatprep.mubr.f32.mxu1 %v4313_v15  ;;  %v3177_v5 = vpop.f32.mrf.mxu0  ;;  %3348 = vmatprep.subr.mxu1 %v4646_v50  ;;  %v2202_v41 = vpop.permute.xlu1 %2201 }
 0x222   :  { %v2792_v7 = vpop.f32.mrf.mxu1  ;;  %3364 = vmatpush3.msra.mxu1 %v4646_v50 }
 0x223   :  { %3303 = vmatmul.mubr.msk.f32.gmra.mxu0 %vm94_vm0, %v4320_v17  ;;  %v2793_v12 = vadd.f32 %v2792_v7, %v2791_v57  ;;  %v1268_v14 = vpop.f32.mrf.mxu0  ;;  %3349 = vmatprep.subr.mxu1 %v4663_v52  ;;  %v2204_v15 = vpop.permute.xlu0 %2203 }
 0x224   :  { %2692 = vmatmul.mubr.msk.f32.gmra.mxu1 %vm3960_vm10, %v4317_v16  ;;  %3310 = vmatprep.mubr.msk.f32.mxu0 %vm2215_vm1, %v2184_v19  ;;  %v2794_v24 = vpop.f32.mrf.mxu1 }
 0x225   :  { %1939 = vmatprep.mubr.f32.mxu1 %v4311_v4  ;;  %v4770_v29 = vadd.f32 %v2793_v12, %v1268_v14  ;;  %3365 = vmatpush3.msra.mxu1 %v4663_v52  ;;  %v2206_v4 = vpop.permute.xlu1 %2205 }
 0x226   :  { %v2795_v20 = vpop.f32.mrf.mxu1 }
 0x227   :  { %3311 = vmatmul.mubr.msk.f32.vlgmr.msra.gmra.mxu0 %vm2215_vm1, %v2186_v36  ;;  %v2796_v26 = vadd.f32 %v2795_v20, %v2794_v24 }
 0x228   :  { %2694 = vmatmul.mubr.msk.f32.gmra.mxu1 %vm3960_vm10, %v917_v27  ;;  %3313 = vmatprep.mubr.msk.f32.mxu0 %vm2215_vm1, %v2188_v48  ;;  %v2208_v27 = vpop.permute.xlu0 %2207 }
 0x229   :  { %1944 = vmatprep.mubr.f32.mxu1 %v3377_v0  ;;  %v4780_v38 = vadd.f32 %v3177_v5, %v2796_v26  ;;  %v2210_v33 = vpop.permute.xlu1 %2209 }
 0x22b   :  { %3314 = vmatmul.mubr.msk.f32.gmra.mxu0 %vm2215_vm1, %v2190_v55 }
 0x22c   :  { %2696 = vmatmul.mubr.msk.f32.gmra.mxu1 %vm3960_vm10, %v4333_v2  ;;  %3316 = vmatprep.mubr.msk.f32.mxu0 %vm2215_vm1, %v2192_v56  ;;  %v2212_v44 = vpop.permute.xlu0 %2211 }
 0x22d   :  { %3305 = vmatprep.mubr.msk.f32.mxu1 %vm94_vm0, %v965_v18  ;;  %v2214_v3 = vpop.permute.xlu1 %2213 }
 0x22f   :  { %3317 = vmatmul.mubr.msk.f32.gmra.mxu0 %vm2215_vm1, %v2194_v11 }
 0x230   :  { %3306 = vmatmul.mubr.msk.f32.vlgmr.msra.gmra.mxu1 %vm94_vm0, %v4336_v10  ;;  %3319 = vmatprep.mubr.msk.f32.mxu0 %vm2215_vm1, %v2196_v13  ;;  %v2797_v42 = vpop.f32.mrf.mxu1 }
 0x231   :  { %v3180_v43 = vpop.f32.mrf.mxu0 }
 0x232   :  { %v2798_v16 = vpop.f32.mrf.mxu1 }
 0x233   :  { %3320 = vmatmul.mubr.msk.f32.gmra.mxu0 %vm2215_vm1, %v2198_v37  ;;  %v2799_v51 = vadd.f32 %v2798_v16, %v2797_v42  ;;  %v1278_v17 = vpop.f32.mrf.mxu0 }
 0x234   :  { %3322 = vmatprep.mubr.msk.f32.mxu0 %vm2215_vm1, %v2200_v40  ;;  %v2800_v18 = vpop.f32.mrf.mxu1 }
 0x235   :  { %v4796_v0 = vadd.f32 %v2799_v51, %v1278_v17 }
 0x236   :  { %v2801_v2 = vpop.f32.mrf.mxu1 }
 0x237   :  { %3323 = vmatmul.mubr.msk.f32.gmra.mxu0 %vm2215_vm1, %v2202_v41  ;;  %v2802_v10 = vadd.f32 %v2801_v2, %v2800_v18 }
 0x238   :  { %3325 = vmatprep.mubr.msk.f32.mxu0 %vm2215_vm1, %v2204_v15 }
 0x239   :  { %v4800_v28 = vadd.f32 %v3180_v43, %v2802_v10 }
 0x23b   :  { %3326 = vmatmul.mubr.msk.f32.gmra.mxu0 %vm2215_vm1, %v2206_v4 }
 0x23c   :  { %3328 = vmatprep.mubr.msk.f32.mxu0 %vm2215_vm1, %v2208_v27 }
 0x23f   :  { %3329 = vmatmul.mubr.msk.f32.gmra.mxu0 %vm2215_vm1, %v2210_v33 }
 0x240   :  { %3331 = vmatprep.mubr.msk.f32.mxu0 %vm2215_vm1, %v2212_v44  ;;  %v2803_v58 = vpop.f32.mrf.mxu1 }
 0x241   :  { %v3183_v9 = vpop.f32.mrf.mxu0 }
 0x242   :  { %v2804_v49 = vpop.f32.mrf.mxu1 }
 0x243   :  { %3332 = vmatmul.mubr.msk.f32.gmra.mxu0 %vm2215_vm1, %v2214_v3  ;;  %v2805_v62 = vadd.f32 %v2804_v49, %v2803_v58  ;;  %v1288_v63 = vpop.f32.mrf.mxu0 }
 0x244   :  { %v2806_v30 = vpop.f32.mrf.mxu1 }
 0x245   :  { %v4807_v32 = vadd.f32 %v2805_v62, %v1288_v63 }
 0x246   :  { %v2807_v1 = vpop.f32.mrf.mxu1 }
 0x247   :  { %v2808_v34 = vadd.f32 %v2807_v1, %v2806_v30 }
 0x249   :  { %v4809_v60 = vadd.f32 %v3183_v9, %v2808_v34 }
 0x253   :  { %v2809_v61 = vpop.f32.mrf.mxu1 }
 0x254   :  { %v3186_v39 = vpop.f32.mrf.mxu0 }
 0x255   :  { %v2810_v6 = vpop.f32.mrf.mxu1 }
 0x256   :  { %v2811_v21 = vadd.f32 %v2810_v6, %v2809_v61  ;;  %v1298_v47 = vpop.f32.mrf.mxu0 }
 0x257   :  { %v2812_v50 = vpop.f32.mrf.mxu1 }
 0x258   :  { %v4811_v52 = vadd.f32 %v2811_v21, %v1298_v47 }
 0x259   :  { %v2813_v59 = vpop.f32.mrf.mxu1 }
 0x25a   :  { %v2814_v8 = vadd.f32 %v2813_v59, %v2812_v50 }
 0x25c   :  { %v4813_v53 = vadd.f32 %v3186_v39, %v2814_v8 }
 0x263   :  { %v2815_v54 = vpop.f32.mrf.mxu1 }
 0x264   :  { %v3189_v35 = vpop.f32.mrf.mxu0 }
 0x265   :  { %v2816_v25 = vpop.f32.mrf.mxu1 }
 0x266   :  { %v2817_v19 = vadd.f32 %v2816_v25, %v2815_v54  ;;  %v1308_v22 = vpop.f32.mrf.mxu0 }
 0x267   :  { %v2818_v31 = vpop.f32.mrf.mxu1 }
 0x268   :  { %v4815_v36 = vadd.f32 %v2817_v19, %v1308_v22 }
 0x269   :  { %v2819_v46 = vpop.f32.mrf.mxu1 }
 0x26a   :  { %v2820_v48 = vadd.f32 %v2819_v46, %v2818_v31 }
 0x26c   :  { %v4817_v55 = vadd.f32 %v3189_v35, %v2820_v48 }
 0x273   :  { %v2821_v56 = vpop.f32.mrf.mxu1 }
 0x274   :  { %v3192_v57 = vpop.f32.mrf.mxu0 }
 0x275   :  { %v2822_v5 = vpop.f32.mrf.mxu1 }
 0x276   :  { %v2823_v7 = vadd.f32 %v2822_v5, %v2821_v56  ;;  %v1318_v11 = vpop.f32.mrf.mxu0 }
 0x277   :  { %v2824_v12 = vpop.f32.mrf.mxu1 }
 0x278   :  { %v4819_v14 = vadd.f32 %v2823_v7, %v1318_v11 }
 0x279   :  { %v2825_v24 = vpop.f32.mrf.mxu1 }
 0x27a   :  { %v2826_v13 = vadd.f32 %v2825_v24, %v2824_v12 }
 0x27c   :  { %v4821_v20 = vadd.f32 %v3192_v57, %v2826_v13 }
 0x280   :  { %v2827_v26 = vpop.f32.mrf.mxu1 }
 0x281   :  { %v3195_v37 = vpop.f32.mrf.mxu0 }
 0x282   :  { %v2828_v40 = vpop.f32.mrf.mxu1 }
 0x283   :  { %v2829_v41 = vadd.f32 %v2828_v40, %v2827_v26  ;;  %v1328_v42 = vpop.f32.mrf.mxu0 }
 0x284   :  { %v2830_v43 = vpop.f32.mrf.mxu1 }
 0x285   :  { %v4823_v15 = vadd.f32 %v2829_v41, %v1328_v42  ;;  %v2897_v16 = vpop.f32.mrf.mxu0 }
 0x286   :  { %v2831_v51 = vpop.f32.mrf.mxu1 }
 0x287   :  { %v2832_v17 = vadd.f32 %v2831_v51, %v2830_v43  ;;  %v2898_v4 = vpop.f32.mrf.mxu0 }
 0x288   :  { %v2899_v18 = vadd.f32 %v2898_v4, %v2897_v16  ;;  %v3230_v2 = vpop.f32.mrf.mxu1 }
 0x289   :  { %v4825_v10 = vadd.f32 %v3195_v37, %v2832_v17  ;;  %v2900_v27 = vpop.f32.mrf.mxu0 }
 0x28a   :  { %v1404_v33 = vadd.f32 %v2899_v18, %v4723_v23  ;;  %v1548_v44 = vpop.f32.mrf.mxu1 }
 0x28b   :  { %v2901_v3 = vpop.f32.mrf.mxu0 }
 0x28c   :  { %v4828_v58 = vadd.f32 %v1548_v44, %v1404_v33  ;;  %v2902_v9 = vadd.f32 %v2901_v3, %v2900_v27 }
 0x28d   :  { %v3233_v49 = vpop.f32.mrf.mxu1 }
 0x28e   :  { %v1409_v62 = vadd.f32 %v2902_v9, %v4736_v45  ;;  %v2903_v63 = vpop.f32.mrf.mxu0 }
 0x28f   :  { %v1558_v30 = vpop.f32.mrf.mxu1 }
 0x290   :  { %v2904_v1 = vpop.f32.mrf.mxu0  ;;  %v4831_v34 = vadd.f32 %v3230_v2, %v1409_v62 }
 0x291   :  { %v2905_v61 = vadd.f32 %v2904_v1, %v2903_v63 }
 0x292   :  { %v3236_v39 = vpop.f32.mrf.mxu1 }
 0x293   :  { %v1414_v6 = vadd.f32 %v2905_v61, %v4770_v29  ;;  %v2906_v21 = vpop.f32.mrf.mxu0 }
 0x294   :  { %v1568_v47 = vpop.f32.mrf.mxu1 }
 0x295   :  { %v2907_v23 = vpop.f32.mrf.mxu0  ;;  %v4834_v50 = vadd.f32 %v1558_v30, %v1414_v6 }
 0x296   :  { %v2908_v59 = vadd.f32 %v2907_v23, %v2906_v21 }
 0x297   :  { %v3239_v8 = vpop.f32.mrf.mxu1 }
 0x298   :  { %v1419_v54 = vadd.f32 %v2908_v59, %v4780_v38  ;;  %v2909_v35 = vpop.f32.mrf.mxu0 }
 0x299   :  { %v1578_v45 = vpop.f32.mrf.mxu1 }
 0x29a   :  { %v2910_v25 = vpop.f32.mrf.mxu0  ;;  %v4837_v19 = vadd.f32 %v3233_v49, %v1419_v54 }
 0x29b   :  { %v2911_v22 = vadd.f32 %v2910_v25, %v2909_v35  ;;  %v3242_v31 = vpop.f32.mrf.mxu1 }
 0x29c   :  { %v2912_v46 = vpop.f32.mrf.mxu0 }
 0x29d   :  { %v1424_v48 = vadd.f32 %v2911_v22, %v4796_v0  ;;  %v1588_v29 = vpop.f32.mrf.mxu1 }
 0x29e   :  { %v2913_v56 = vpop.f32.mrf.mxu0 }
 0x29f   :  { %v2914_v57 = vadd.f32 %v2913_v56, %v2912_v46  ;;  %v3245_v5 = vpop.f32.mrf.mxu1  ;;  %v4840_v7 = vadd.f32 %v1568_v47, %v1424_v48 }
 0x2a1   :  { %v1429_v11 = vadd.f32 %v2914_v57, %v4800_v28  ;;  %v2915_v12 = vpop.f32.mrf.mxu0  ;;  %v1598_v38 = vpop.f32.mrf.mxu1 }
 0x2a3   :  { %v2916_v24 = vpop.f32.mrf.mxu0  ;;  %v4843_v13 = vadd.f32 %v3236_v39, %v1429_v11 }
 0x2a4   :  { %v2917_v26 = vadd.f32 %v2916_v24, %v2915_v12  ;;  %v3248_v37 = vpop.f32.mrf.mxu1 }
 0x2a6   :  { %v1434_v40 = vadd.f32 %v2917_v26, %v4807_v32  ;;  %v2918_v41 = vpop.f32.mrf.mxu0  ;;  %v1608_v42 = vpop.f32.mrf.mxu1 }
 0x2a8   :  { %v2919_v0 = vpop.f32.mrf.mxu0  ;;  %v4846_v43 = vadd.f32 %v1578_v45, %v1434_v40 }
 0x2a9   :  { %v2920_v16 = vadd.f32 %v2919_v0, %v2918_v41 }
 0x2aa   :  { %v3251_v51 = vpop.f32.mrf.mxu1 }
 0x2ab   :  { %v1439_v17 = vadd.f32 %v2920_v16, %v4809_v60  ;;  %v2921_v4 = vpop.f32.mrf.mxu0 }
 0x2ac   :  { %v1618_v28 = vpop.f32.mrf.mxu1 }
 0x2ad   :  { %v2922_v18 = vpop.f32.mrf.mxu0  ;;  %v4849_v2 = vadd.f32 %v3239_v8, %v1439_v17 }
 0x2ae   :  { %v2923_v27 = vadd.f32 %v2922_v18, %v2921_v4 }
 0x2af   :  { %v2924_v33 = vpop.f32.mrf.mxu0 }
 0x2b0   :  { %v1444_v44 = vadd.f32 %v2923_v27, %v4811_v52  ;;  %v3009_v3 = vpop.f32.mrf.mxu1 }
 0x2b1   :  { %v2925_v32 = vpop.f32.mrf.mxu0 }
 0x2b2   :  { %v3010_v9 = vpop.f32.mrf.mxu1  ;;  %v2926_v49 = vadd.f32 %v2925_v32, %v2924_v33  ;;  %v4852_v62 = vadd.f32 %v1588_v29, %v1444_v44 }
 0x2b3   :  { %v2927_v63 = vpop.f32.mrf.mxu0 }
 0x2b4   :  { %v1449_v30 = vadd.f32 %v2926_v49, %v4813_v53  ;;  %v3012_v1 = vpop.f32.mrf.mxu1 }
 0x2b5   :  { %v2928_v60 = vpop.f32.mrf.mxu0 }
 0x2b6   :  { %v3013_v61 = vpop.f32.mrf.mxu1  ;;  %v2929_v39 = vadd.f32 %v2928_v60, %v2927_v63  ;;  %v4855_v6 = vadd.f32 %v3242_v31, %v1449_v30 }
 0x2b7   :  { %v2930_v21 = vpop.f32.mrf.mxu0 }
 0x2b8   :  { %v1454_v47 = vadd.f32 %v2929_v39, %v4815_v36  ;;  %v3015_v23 = vpop.f32.mrf.mxu1 }
 0x2b9   :  { %v2931_v52 = vpop.f32.mrf.mxu0 }
 0x2ba   :  { %v3016_v59 = vpop.f32.mrf.mxu1  ;;  %v2932_v8 = vadd.f32 %v2931_v52, %v2930_v21  ;;  %v4858_v54 = vadd.f32 %v1598_v38, %v1454_v47  ;;  %v3011_v47 = vadd.f32 %v3010_v9, %v3009_v3 }
 0x2bb   :  { %v2933_v35 = vpop.f32.mrf.mxu0 }
 0x2bc   :  { %v1459_v45 = vadd.f32 %v2932_v8, %v4817_v55  ;;  %v3018_v25 = vpop.f32.mrf.mxu1 }
 0x2bd   :  { %v2934_v53 = vpop.f32.mrf.mxu0 }
 0x2be   :  { %v3019_v22 = vpop.f32.mrf.mxu1  ;;  %v2935_v46 = vadd.f32 %v2934_v53, %v2933_v35  ;;  %v4861_v48 = vadd.f32 %v3245_v5, %v1459_v45 }
 0x2bf   :  { %v2936_v31 = vpop.f32.mrf.mxu0  ;;  %v3020_v8 = vadd.f32 %v3019_v22, %v3018_v25 }
 0x2c0   :  { %v1464_v29 = vadd.f32 %v2935_v46, %v4819_v14  ;;  %v3021_v56 = vpop.f32.mrf.mxu1 }
 0x2c1   :  { %v2937_v36 = vpop.f32.mrf.mxu0 }
 0x2c2   :  { %v3022_v57 = vpop.f32.mrf.mxu1  ;;  %v2938_v11 = vadd.f32 %v2937_v36, %v2936_v31  ;;  %v4864_v12 = vadd.f32 %v1608_v42, %v1464_v29  ;;  %v3017_v31 = vadd.f32 %v3016_v59, %v3015_v23 }
 0x2c3   :  { %v2939_v38 = vpop.f32.mrf.mxu0 }
 0x2c4   :  { %v1469_v24 = vadd.f32 %v2938_v11, %v4821_v20  ;;  %v3024_v26 = vpop.f32.mrf.mxu1 }
 0x2c5   :  { %v2940_v55 = vpop.f32.mrf.mxu0 }
 0x2c6   :  { %v4867_v40 = vadd.f32 %v3248_v37, %v1469_v24  ;;  %v3025_v41 = vpop.f32.mrf.mxu1  ;;  %v2941_v0 = vadd.f32 %v2940_v55, %v2939_v38  ;;  %v3023_v38 = vadd.f32 %v3022_v57, %v3021_v56 }
 0x2c7   :  { %v2942_v5 = vpop.f32.mrf.mxu0  ;;  %v3026_v11 = vadd.f32 %v3025_v41, %v3024_v26 }
 0x2c8   :  { %v1474_v16 = vadd.f32 %v2941_v0, %v4823_v15  ;;  %v3027_v17 = vpop.f32.mrf.mxu1  ;;  %v3014_v15 = vadd.f32 %v3013_v61, %v3012_v1  ;;  %v4881_v1 = vld [vmem:[%s5004_s5] ss:$0 sm:$0xff] }
 0x2c9   :  { %v2943_v14 = vpop.f32.mrf.mxu0 }
 0x2ca   :  { %v3028_v4 = vpop.f32.mrf.mxu1  ;;  %v2944_v18 = vadd.f32 %v2943_v14, %v2942_v5  ;;  %v4870_v27 = vadd.f32 %v1618_v28, %v1474_v16 }
 0x2cb   :  { %v3286_v42 = vpop.f32.mrf.mxu0  ;;  %v3029_v57 = vadd.f32 %v3028_v4, %v3027_v17 }
 0x2cc   :  { %v1479_v33 = vadd.f32 %v2944_v18, %v4825_v10  ;;  %v3030_v44 = vpop.f32.mrf.mxu1  ;;  %v2022_v28 = vadd.f32 %v3286_v42, %v3014_v15 }
 0x2cd   :  { %v2016_v20 = vpop.f32.mrf.mxu0 }
 0x2ce   :  { %v3031_v32 = vpop.f32.mrf.mxu1  ;;  %v4873_v49 = vadd.f32 %v3251_v51, %v1479_v33  ;;  %v2017_v45 = vadd.f32 %v3011_v47, %v2016_v20  ;;  %v2096_v29 = vadd.f32 %v2022_v28, %v4831_v34 }
 0x2cf   :  { %v3289_v37 = vpop.f32.mrf.mxu0  ;;  %v3032_v24 = vadd.f32 %v3031_v32, %v3030_v44 }
 0x2d0   :  { %v3033_v63 = vpop.f32.mrf.mxu1  ;;  %v2032_v10 = vadd.f32 %v3289_v37, %v3020_v8  ;;  %v2095_v3 = vadd.f32 %v2017_v45, %v4828_v58  ;;  %v2119_v34 = vadd.f32 %v4881_v1, %v2096_v29 }
 0x2d1   :  { %v2026_v30 = vpop.f32.mrf.mxu0 }
 0x2d2   :  { %v3034_v60 = vpop.f32.mrf.mxu1  ;;  %v2027_v9 = vadd.f32 %v3017_v31, %v2026_v30  ;;  %v2098_v25 = vadd.f32 %v2032_v10, %v4837_v19  ;;  %v2118_v26 = vadd.f32 %v4881_v1, %v2095_v3  ;;  %v2151_v42 = vmul.f32 0.2, %v2119_v34 }
 0x2d3   :  { %v3292_v39 = vpop.f32.mrf.mxu0  ;;  %vm2135_vm0 = vcmp.gt.f32.partialorder %v2119_v34, 0.0  ;;  %v3035_v15 = vadd.f32 %v3034_v60, %v3033_v63 }
 0x2d4   :  { %v3036_v21 = vpop.f32.mrf.mxu1  ;;  %v2042_v23 = vadd.f32 %v3292_v39, %v3026_v11  ;;  %v2097_v41 = vadd.f32 %v2027_v9, %v4834_v50  ;;  %v2121_v58 = vadd.f32 %v4881_v1, %v2098_v25  ;;  %v2150_v50 = vmul.f32 0.2, %v2118_v26 }
 0x2d5   :  { %v2036_v52 = vpop.f32.mrf.mxu0  ;;  %vm2134_vm10 = vcmp.gt.f32.partialorder %v2118_v26, 0.0 }
 0x2d6   :  { %v3037_v35 = vpop.f32.mrf.mxu1  ;;  %v2037_v0 = vadd.f32 %v3023_v38, %v2036_v52  ;;  %v2100_v19 = vadd.f32 %v2042_v23, %v4843_v13  ;;  %v2120_v33 = vadd.f32 %v4881_v1, %v2097_v41  ;;  %v2153_v39 = vmul.f32 0.2, %v2121_v58 }
 0x2d7   :  { %v3295_v53 = vpop.f32.mrf.mxu0  ;;  %v3038_v32 = vadd.f32 %v3037_v35, %v3036_v21  ;;  %vm2137_vm12 = vcmp.gt.f32.partialorder %v2121_v58, 0.0  ;;  %v4906_v21 = vld [vmem:[%s5005_s6] ss:$0 sm:$0xff]  ;;  %v2166_v35 = vsel %vm2134_vm10, %v2118_v26, %v2150_v50 }
 0x2d8   :  { %v4875_v46 = vpop.f32.mrf.mxu1  ;;  %v2052_v14 = vadd.f32 %v3295_v53, %v3032_v24  ;;  %v2099_v44 = vadd.f32 %v2037_v0, %v4840_v7  ;;  %v2123_v13 = vadd.f32 %v4881_v1, %v2100_v19  ;;  %v2167_v7 = vsel %vm2135_vm0, %v2119_v34, %v2151_v42 }
 0x2d9   :  { %v2046_v51 = vpop.f32.mrf.mxu0  ;;  %v2152_v53 = vmul.f32 0.2, %v2120_v33  ;;  %vm2136_vm13 = vcmp.gt.f32.partialorder %v2120_v33, 0.0 }
 0x2da   :  { %v3040_v36 = vpop.f32.mrf.mxu1  ;;  %v2047_v37 = vadd.f32 %v3029_v57, %v2046_v51  ;;  %v2102_v17 = vadd.f32 %v2052_v14, %v4849_v2  ;;  %v2122_v8 = vadd.f32 %v4881_v1, %v2099_v44  ;;  %v2169_v51 = vsel %vm2137_vm12, %v2121_v58, %v2153_v39 }
 0x2db   :  { %v3298_v61 = vpop.f32.mrf.mxu0  ;;  %vm2139_vm14 = vcmp.gt.f32.partialorder %v2123_v13, 0.0  ;;  %v2155_v11 = vmul.f32 0.2, %v2123_v13  ;;  %v3041_v3 = vadd.f32 %v3040_v36, %v4875_v46  ;;  %v2168_v23 = vsel %vm2136_vm13, %v2120_v33, %v2152_v53 }
 0x2dc   :  { %v3042_v22 = vpop.f32.mrf.mxu1  ;;  %v2062_v47 = vadd.f32 %v3298_v61, %v3038_v32  ;;  %v2101_v2 = vadd.f32 %v2047_v37, %v4846_v43  ;;  %v2125_v63 = vadd.f32 %v4881_v1, %v2102_v17  ;;  %vm2138_vm15 = vcmp.gt.f32.partialorder %v2122_v8, 0.0 }
 0x2dd   :  { %v2056_v59 = vpop.f32.mrf.mxu0  ;;  %v2171_v0 = vsel %vm2139_vm14, %v2123_v13, %v2155_v11 }
 0x2de   :  { %v3043_v55 = vpop.f32.mrf.mxu1  ;;  %v2057_v60 = vadd.f32 %v3035_v15, %v2056_v59  ;;  %v2104_v9 = vadd.f32 %v2062_v47, %v4855_v6  ;;  %v2124_v34 = vadd.f32 %v4881_v1, %v2101_v2  ;;  %v2154_v6 = vmul.f32 0.2, %v2122_v8 }
 0x2df   :  { %v3301_v5 = vpop.f32.mrf.mxu0  ;;  %v3044_v28 = vadd.f32 %v3043_v55, %v3042_v22  ;;  %vm2141_vm2 = vcmp.gt.f32.partialorder %v2125_v63, 0.0  ;;  %v2157_v57 = vmul.f32 0.2, %v2125_v63 }
 0x2e0   :  { %v4889_v16 = vpop.f32.mrf.mxu1  ;;  %v2103_v55 = vadd.f32 %v2057_v60, %v4852_v62  ;;  %v2156_v39 = vmul.f32 0.2, %v2124_v34  ;;  %vm2140_vm3 = vcmp.gt.f32.partialorder %v2124_v34, 0.0 }
 0x2e1   :  { %v2066_v56 = vpop.f32.mrf.mxu0  ;;  %v2072_v38 = vadd.f32 %v3301_v5, %v3044_v28  ;;  %v2127_v5 = vadd.f32 %v4881_v1, %v2104_v9  ;;  %v2173_v47 = vsel %vm2141_vm2, %v2125_v63, %v2157_v57 }
 0x2e2   :  { %v4892_v18 = vpop.f32.mrf.mxu1  ;;  %v2067_v26 = vadd.f32 %v3041_v3, %v2066_v56  ;;  %v2172_v53 = vsel %vm2140_vm3, %v2124_v34, %v2156_v39 }
 0x2e3   :  { %v4896_v20 = vpop.f32.mrf.mxu0  ;;  %v2106_v42 = vadd.f32 %v2072_v38, %v4861_v48  ;;  %v3047_v62 = vadd.f32 %v4892_v18, %v4889_v16  ;;  %v2126_v48 = vadd.f32 %v4881_v1, %v2103_v55  ;;  %vm2143_vm4 = vcmp.gt.f32.partialorder %v2127_v5, 0.0 }
 0x2e4   :  { %v3048_v30 = vpop.f32.mrf.mxu1  ;;  %v2105_v13 = vadd.f32 %v2067_v26, %v4858_v54 }
 0x2e5   :  { %v4900_v4 = vpop.f32.mrf.mxu0  ;;  %v2158_v60 = vmul.f32 0.2, %v2126_v48  ;;  %vm2142_vm5 = vcmp.gt.f32.partialorder %v2126_v48, 0.0 }
 0x2e6   :  { %v3049_v52 = vpop.f32.mrf.mxu1  ;;  %v2077_v16 = vadd.f32 %v3047_v62, %v4900_v4  ;;  %v2128_v2 = vadd.f32 %v4881_v1, %v2105_v13 }
 0x2e7   :  { %v3312_v45 = vpop.f32.mrf.mxu0  ;;  %v3050_v43 = vadd.f32 %v3049_v52, %v3048_v30  ;;  %v2170_v30 = vsel %vm2138_vm15, %v2122_v8, %v2154_v6  ;;  %v2159_v52 = vmul.f32 0.2, %v2127_v5 }
 0x2e8   :  { %v3051_v10 = vpop.f32.mrf.mxu1  ;;  %v2397_v31 = vadd.f32 %v3312_v45, %v2167_v7  ;;  %v2129_v7 = vadd.f32 %v4881_v1, %v2106_v42  ;;  %vm2144_vm7 = vcmp.gt.f32.partialorder %v2128_v2, 0.0 }
 0x2e9   :  { %v2317_v29 = vpop.f32.mrf.mxu0  ;;  %v2082_v56 = vadd.f32 %v4896_v20, %v3050_v43  ;;  %v2175_v11 = vsel %vm2143_vm4, %v2127_v5, %v2159_v52  ;;  %v2174_v43 = vsel %vm2142_vm5, %v2126_v48, %v2158_v60 }
 0x2ea   :  { %v2420_v61 = vadd.f32 %v4906_v21, %v2397_v31  ;;  %v3052_v25 = vpop.f32.mrf.mxu1  ;;  %v2396_v22 = vadd.f32 %v2317_v29, %v2166_v35  ;;  %v2107_v31 = vadd.f32 %v2077_v16, %v4864_v12  ;;  %v2161_v9 = vmul.f32 0.2, %v2129_v7 }
 0x2eb   :  { %v3315_v24 = vpop.f32.mrf.mxu0  ;;  %v2108_v8 = vadd.f32 %v2082_v56, %v4867_v40  ;;  %v3053_v54 = vadd.f32 %v3052_v25, %v3051_v10  ;;  %vm2145_vm6 = vcmp.gt.f32.partialorder %v2129_v7, 0.0 }
 0x2ec   :  { %2436 = vst [vmem:[%s5006_s7 + $0x8] sm:$0xff] %v2420_v61  ;;  %v2419_v59 = vadd.f32 %v4906_v21, %v2396_v22  ;;  %v3054_v46 = vpop.f32.mrf.mxu1  ;;  %v2399_v36 = vadd.f32 %v3315_v24, %v2169_v51  ;;  %v2130_v22 = vadd.f32 %v4881_v1, %v2107_v31 }
 0x2ed   :  { %v2327_v41 = vpop.f32.mrf.mxu0  ;;  %v2131_v61 = vadd.f32 %v4881_v1, %v2108_v8 }
 0x2ee   :  { %2435 = vst [vmem:[%s5006_s7] sm:$0xff] %v2419_v59  ;;  %v2422_v58 = vadd.f32 %v4906_v21, %v2399_v36  ;;  %v3055_v19 = vpop.f32.mrf.mxu1  ;;  %v2398_v14 = vadd.f32 %v2327_v41, %v2168_v23  ;;  %v2162_v5 = vmul.f32 0.2, %v2130_v22  ;;  %vm2146_vm9 = vcmp.gt.f32.partialorder %v2130_v22, 0.0 }
 0x2ef   :  { %v3056_v33 = vadd.f32 %v3055_v19, %v3054_v46  ;;  %v3318_v44 = vpop.f32.mrf.mxu0  ;;  %v2177_v46 = vsel %vm2145_vm6, %v2129_v7, %v2161_v9  ;;  %v2163_v6 = vmul.f32 0.2, %v2131_v61  ;;  %vm2147_vm8 = vcmp.gt.f32.partialorder %v2131_v61, 0.0 }
 0x2f0   :  { %2438 = vst [vmem:[%s5006_s7 + $0x18] sm:$0xff] %v2422_v58  ;;  %v2421_v50 = vadd.f32 %v4906_v21, %v2398_v14  ;;  %v3307_v32 = vpop.f32.mrf.mxu1  ;;  %v2401_v37 = vadd.f32 %v3318_v44, %v2171_v0  ;;  %v2178_v56 = vsel %vm2146_vm9, %v2130_v22, %v2162_v5 }
 0x2f1   :  { %v2337_v18 = vpop.f32.mrf.mxu0  ;;  %v2092_v28 = vadd.f32 %v3307_v32, %v3056_v33  ;;  %v2179_v14 = vsel %vm2147_vm8, %v2131_v61, %v2163_v6 }
 0x2f2   :  { %2437 = vst [vmem:[%s5006_s7 + $0x10] sm:$0xff] %v2421_v50  ;;  %v2424_v20 = vadd.f32 %v4906_v21, %v2401_v37  ;;  %v2086_v17 = vpop.f32.mrf.mxu1  ;;  %v2400_v15 = vadd.f32 %v2337_v18, %v2170_v30 }
 0x2f3   :  { %v3321_v4 = vpop.f32.mrf.mxu0  ;;  %v2087_v51 = vadd.f32 %v3053_v54, %v2086_v17  ;;  %v2110_v29 = vadd.f32 %v2092_v28, %v4873_v49  ;;  %v2160_v49 = vmul.f32 0.2, %v2128_v2 }
 0x2f4   :  { %2440 = vst [vmem:[%s5006_s7 + $0x28] sm:$0xff] %v2424_v20  ;;  %v2423_v45 = vadd.f32 %v4906_v21, %v2400_v15  ;;  %v2403_v35 = vadd.f32 %v3321_v4, %v2173_v47 }
 0x2f5   :  { %v2347_v63 = vpop.f32.mrf.mxu0  ;;  %v2109_v38 = vadd.f32 %v2087_v51, %v4870_v27  ;;  %v2133_v59 = vadd.f32 %v4881_v1, %v2110_v29  ;;  %v2176_v41 = vsel %vm2144_vm7, %v2128_v2, %v2160_v49 }
 0x2f6   :  { %2439 = vst [vmem:[%s5006_s7 + $0x20] sm:$0xff] %v2423_v45  ;;  %v2426_v40 = vadd.f32 %v4906_v21, %v2403_v35  ;;  %v2402_v10 = vadd.f32 %v2347_v63, %v2172_v53 }
 0x2f7   :  { %v3324_v3 = vpop.f32.mrf.mxu0  ;;  %v2132_v26 = vadd.f32 %v4881_v1, %v2109_v38  ;;  %v2165_v42 = vmul.f32 0.2, %v2133_v59  ;;  %vm2149_vm11 = vcmp.gt.f32.partialorder %v2133_v59, 0.0 }
 0x2f8   :  { %2442 = vst [vmem:[%s5006_s7 + $0x38] sm:$0xff] %v2426_v40  ;;  %v2425_v12 = vadd.f32 %v4906_v21, %v2402_v10  ;;  %v2405_v25 = vadd.f32 %v3324_v3, %v2175_v11 }
 0x2f9   :  { %v2357_v24 = vpop.f32.mrf.mxu0  ;;  %v2164_v44 = vmul.f32 0.2, %v2132_v26  ;;  %vm2148_vm1 = vcmp.gt.f32.partialorder %v2132_v26, 0.0  ;;  %v2181_v37 = vsel %vm2149_vm11, %v2133_v59, %v2165_v42 }
 0x2fa   :  { %2441 = vst [vmem:[%s5006_s7 + $0x30] sm:$0xff] %v2425_v12  ;;  %v2428_v23 = vadd.f32 %v4906_v21, %v2405_v25  ;;  %v2404_v34 = vadd.f32 %v2357_v24, %v2174_v43 }
 0x2fb   :  { %v3327_v36 = vpop.f32.mrf.mxu0  ;;  %v2180_v13 = vsel %vm2148_vm1, %v2132_v26, %v2164_v44 }
 0x2fc   :  { %2444 = vst [vmem:[%s5006_s7 + $0x48] sm:$0xff] %v2428_v23  ;;  %v2427_v27 = vadd.f32 %v4906_v21, %v2404_v34  ;;  %v2407_v55 = vadd.f32 %v3327_v36, %v2177_v46 }
 0x2fd   :  { %v2367_v0 = vpop.f32.mrf.mxu0 }
 0x2fe   :  { %2443 = vst [vmem:[%s5006_s7 + $0x40] sm:$0xff] %v2427_v27  ;;  %v2430_v58 = vadd.f32 %v4906_v21, %v2407_v55  ;;  %v2406_v19 = vadd.f32 %v2367_v0, %v2176_v41 }
 0x2ff   :  { %v3330_v57 = vpop.f32.mrf.mxu0 }
 0x300   :  { %2446 = vst [vmem:[%s5006_s7 + $0x58] sm:$0xff] %v2430_v58  ;;  %v2429_v1 = vadd.f32 %v4906_v21, %v2406_v19  ;;  %v2409_v62 = vadd.f32 %v3330_v57, %v2179_v14 }
 0x301   :  { %v2377_v33 = vpop.f32.mrf.mxu0 }
 0x302   :  { %2445 = vst [vmem:[%s5006_s7 + $0x50] sm:$0xff] %v2429_v1  ;;  %v2432_v50 = vadd.f32 %v4906_v21, %v2409_v62  ;;  %v2408_v32 = vadd.f32 %v2377_v33, %v2178_v56 }
 0x303   :  { %v3333_v30 = vpop.f32.mrf.mxu0 }
 0x304   :  { %2448 = vst [vmem:[%s5006_s7 + $0x68] sm:$0xff] %v2432_v50  ;;  %v2431_v39 = vadd.f32 %v4906_v21, %v2408_v32  ;;  %v2411_v48 = vadd.f32 %v3333_v30, %v2181_v37 }
 0x305   :  { %v2387_v16 = vpop.f32.mrf.mxu0 }
 0x306   :  { %2447 = vst [vmem:[%s5006_s7 + $0x60] sm:$0xff] %v2431_v39  ;;  %v2434_v18 = vadd.f32 %v4906_v21, %v2411_v48  ;;  %v2410_v20 = vadd.f32 %v2387_v16, %v2180_v13 }
 0x308   :  { %2450 = vst [vmem:[%s5006_s7 + $0x78] sm:$0xff] %v2434_v18  ;;  %v2433_v17 = vadd.f32 %v4906_v21, %v2410_v20 }
 0x30a   :  { %2449 = vst [vmem:[%s5006_s7 + $0x70] sm:$0xff] %v2433_v17 }

</bundles_post_ra>
